<compile_context>
chip_gen: v7x
topology: tpu7x:2x2x1
jax: 0.10.0
libtpu: 0.0.40
codegen_flags: <defaults>
</compile_context>

<pallas_src>
import functools

import numpy as np
import jax
import jax.numpy as jnp
from jax.experimental import pallas as pl
from jax.experimental.pallas import tpu as pltpu


def _round_up(x, m):
    return ((x + m - 1) // m) * m


def _uiqi_pan_kernel(ab_ref, img_ref, pan_ref, imgt_ref, pant_ref,
                     rmat_ref, cmat_ref, out_ref, hb1_s, hb2_s,
                     *, ksize, tile_h, ho, wo):
    """One grid step = one strip of tile_h conv-output rows.

    ab_ref               : (2,) SMEM   [alpha, beta] for pan2 = pan*alpha + beta
    img_ref, pan_ref     : (tile_h, Wp2_pad) main input rows of the padded images
    imgt_ref, pant_ref   : (k_pad, Wp2_pad)  halo tail rows below the main block
    rmat_ref             : (tile_h, hbp)     banded 0/1 row box-sum matrix
    cmat_ref             : (Wp2_pad, Wo_pad) banded 0/1 column box-sum matrix
    out_ref              : (8, 128)          per-strip partial q sum (scalar at [0,0])
    hb1_s, hb2_s         : (hbp, Wp2_pad)    VMEM scratch holding the assembled halos
    """
    i = pl.program_id(0)
    alpha = ab_ref[0]
    beta = ab_ref[1]

    # Assemble the halo slabs (main rows + k-1 tail rows, rest is don't-care padding).
    hb1_s[0:tile_h, :] = img_ref[...]
    hb1_s[tile_h:, :] = imgt_ref[...]
    hb2_s[0:tile_h, :] = pan_ref[...] * alpha + beta
    hb2_s[tile_h:, :] = pant_ref[...] * alpha + beta

    h1 = hb1_s[...]
    h2 = hb2_s[...]
    rmat = rmat_ref[...]
    cmat = cmat_ref[...]
    inv_k2 = 1.0 / float(ksize * ksize)

    def box(h):
        # (tile_h, hbp) @ (hbp, Wp2_pad) -> row window sums, then
        # (tile_h, Wp2_pad) @ (Wp2_pad, Wo_pad) -> column window sums.  Both on the MXU.
        s = jnp.dot(rmat, h, preferred_element_type=jnp.float32,
                    precision=jax.lax.Precision.HIGHEST)
        return jnp.dot(s, cmat, preferred_element_type=jnp.float32,
                       precision=jax.lax.Precision.HIGHEST) * inv_k2

    mu1 = box(h1)          # avg_conv(img1)
    mu2 = box(h2)          # avg_conv(pan2)
    e12 = box(h1 * h2)     # avg_conv(img1 * pan2)

    mu1_sq = mu1 * mu1
    mu2_sq = mu2 * mu2
    mu1_mu2 = mu1 * mu2
    sigma1_sq = mu1 - mu1_sq            # faithful: avg_conv(img1) - mu1**2
    sigma2_sq = mu2 - mu2_sq            # faithful: avg_conv(pan)  - mu2**2
    sigma12 = e12 - mu1_mu2

    s = sigma1_sq + sigma2_sq
    m = mu1_sq + mu2_sq
    eps = 1e-8
    m_safe = jnp.where(m > eps, m, 1.0)
    s_safe = jnp.where(s > eps, s, 1.0)
    q = jnp.ones_like(s)
    q = jnp.where((s < eps) & (m > eps), 2.0 * mu1_mu2 / m_safe, q)
    q = jnp.where((s > eps) & (m < eps), 2.0 * sigma12 / s_safe, q)
    q = jnp.where((s > eps) & (m > eps),
                  (2.0 * mu1_mu2) * (2.0 * sigma12) / (m_safe * s_safe), q)

    # Mask out the padded rows/columns of this strip and reduce to a scalar.
    rows = jax.lax.broadcasted_iota(jnp.int32, q.shape, 0) + i * tile_h
    cols = jax.lax.broadcasted_iota(jnp.int32, q.shape, 1)
    valid = (rows < ho) & (cols < wo)
    qsum = jnp.sum(jnp.where(valid, q, 0.0))

    ri = jax.lax.broadcasted_iota(jnp.int32, (8, 128), 0)
    ci = jax.lax.broadcasted_iota(jnp.int32, (8, 128), 1)
    out_ref[...] = jnp.where((ri == 0) & (ci == 0), qsum, 0.0)


def uiqi_pan(img1, pan, block_size=32, tile_h=256):
    """Pallas implementation of Uiqi_pan.forward. Accepts (H, W) or (1, 1, H, W)."""
    img1 = jnp.asarray(img1)
    pan = jnp.asarray(pan)
    if img1.ndim == 4:
        assert img1.shape[0] == 1 and img1.shape[1] == 1, "conv is 1->1 channel"
        img1 = img1[0, 0]
        pan = pan[0, 0]
    assert img1.shape == pan.shape and img1.ndim == 2
    img1 = img1.astype(jnp.float32)
    pan = pan.astype(jnp.float32)

    H, W = img1.shape
    k = int(block_size)
    p = k // 2
    Hp2, Wp2 = H + 2 * p, W + 2 * p
    Ho, Wo = Hp2 - k + 1, Wp2 - k + 1            # conv output size

    # ---- geometry: row strips, lane-dense widths ----
    tile_h = max(8, (int(tile_h) // 8) * 8)
    tile_h = min(tile_h, _round_up(Ho, 8))
    G = -(-Ho // tile_h)                         # number of strips
    k_pad = max(8, _round_up(k - 1, 8))          # halo tail rows (padded to sublanes)
    hbp = tile_h + k_pad                         # halo slab height
    Wp2_pad = _round_up(Wp2, 128)
    Wo_pad = _round_up(Wo, 128)
    Hmain = G * tile_h
    Hext = Hmain + k_pad

    # ---- global statistics -> affine alpha/beta for pan (tiny; done wrapper-side) ----
    mu_p = jnp.mean(pan)
    sd_p = jnp.std(pan, ddof=1)                  # torch.std -> unbiased
    p1 = (pan - mu_p) / sd_p
    sd_p1 = jnp.std(p1, ddof=1)                  # ~1.0, kept literal
    alpha = sd_p1 / sd_p
    beta = jnp.mean(img1) - mu_p * alpha
    ab = jnp.stack([alpha, beta]).astype(jnp.float32)

    # ---- circular padding + lane/row zero padding (pure layout plumbing) ----
    img_c = jnp.pad(img1, ((p, p), (p, p)), mode="wrap")
    pan_c = jnp.pad(pan, ((p, p), (p, p)), mode="wrap")
    img_e = jnp.zeros((Hext, Wp2_pad), jnp.float32).at[:Hp2, :Wp2].set(img_c)
    pan_e = jnp.zeros((Hext, Wp2_pad), jnp.float32).at[:Hp2, :Wp2].set(pan_c)
    img_main = img_e[:Hmain]
    pan_main = pan_e[:Hmain]
    tail_rows = ((np.arange(G)[:, None] + 1) * tile_h
                 + np.arange(k_pad)[None, :]).astype(np.int32)   # (G, k_pad)
    img_tail = img_e[tail_rows]                  # (G, k_pad, Wp2_pad)
    pan_tail = pan_e[tail_rows]

    # ---- banded 0/1 matrices for the separable box filter (constants) ----
    jj = np.arange(hbp)[None, :]
    rr = np.arange(tile_h)[:, None]
    rmat = jnp.asarray(((jj >= rr) & (jj < rr + k)).astype(np.float32))       # (tile_h, hbp)
    cc = np.arange(Wp2_pad)[:, None]
    ww = np.arange(Wo_pad)[None, :]
    cmat = jnp.asarray(((cc >= ww) & (cc < ww + k) & (ww < Wo))
                       .astype(np.float32))                                   # (Wp2_pad, Wo_pad)

    # ---- explicit VMEM budget ----
    est_elems = (4 * tile_h * Wp2_pad            # main blocks, double-buffered
                 + 4 * k_pad * Wp2_pad           # halo tails, double-buffered
                 + 2 * tile_h * hbp              # Rmat
                 + 2 * Wp2_pad * Wo_pad          # C
                 + 2 * hbp * Wp2_pad             # halo scratch
                 + (3 * hbp + 3 * tile_h) * Wp2_pad   # halo values + row-sum temporaries
                 + 8 * tile_h * Wo_pad           # mu/q temporaries
                 + 2 * 8 * 128)                  # output blocks
    vmem_limit = int(min(max(4 * est_elems * 3 // 2, 4 << 20), 64 << 20))

    kernel = functools.partial(_uiqi_pan_kernel, ksize=k, tile_h=tile_h, ho=Ho, wo=Wo)
    partials = pl.pallas_call(
        kernel,
        out_shape=jax.ShapeDtypeStruct((G * 8, 128), jnp.float32),
        grid=(G,),
        in_specs=[
            pl.BlockSpec(memory_space=pltpu.MemorySpace.SMEM),           # alpha/beta scalars
            pl.BlockSpec((tile_h, Wp2_pad), lambda i: (i, 0)),            # img main rows
            pl.BlockSpec((tile_h, Wp2_pad), lambda i: (i, 0)),            # pan main rows
            pl.BlockSpec((None, k_pad, Wp2_pad), lambda i: (i, 0, 0)),    # img halo tail
            pl.BlockSpec((None, k_pad, Wp2_pad), lambda i: (i, 0, 0)),    # pan halo tail
            pl.BlockSpec((tile_h, hbp), lambda i: (0, 0)),                # Rmat (resident)
            pl.BlockSpec((Wp2_pad, Wo_pad), lambda i: (0, 0)),            # C    (resident)
        ],
        out_specs=pl.BlockSpec((8, 128), lambda i: (i, 0)),
        scratch_shapes=[
            pltpu.VMEM((hbp, Wp2_pad), jnp.float32),
            pltpu.VMEM((hbp, Wp2_pad), jnp.float32),
        ],
        compiler_params=pltpu.CompilerParams(
            dimension_semantics=("parallel",),
            vmem_limit_bytes=vmem_limit,
        ),
    )(ab, img_main, pan_main, img_tail, pan_tail, rmat, cmat)

    return jnp.sum(partials) / float(Ho * Wo)


def _uiqi_pan_ref(img1, pan, block_size):
    """Pure-JAX reference mirroring the PyTorch module (naive shift-and-add conv)."""
    img1 = jnp.asarray(img1, jnp.float32)
    pan = jnp.asarray(pan, jnp.float32)
    if img1.ndim == 4:
        img1 = img1[0, 0]
        pan = pan[0, 0]
    k = int(block_size)
    p = k // 2

    pan = (pan - jnp.mean(pan)) / jnp.std(pan, ddof=1)
    pan = pan * jnp.std(pan, ddof=1) + jnp.mean(img1)

    def avg_conv(x):
        xp = jnp.pad(x, ((p, p), (p, p)), mode="wrap")
        ho = x.shape[0] + 2 * p - k + 1
        wo = x.shape[1] + 2 * p - k + 1
        out = jnp.zeros((ho, wo), jnp.float32)
        for di in range(k):
            for dj in range(k):
                out = out + xp[di:di + ho, dj:dj + wo]
        return out / (k * k)

    mu1 = avg_conv(img1)
    mu2 = avg_conv(pan)
    mu1_sq = mu1 ** 2
    mu2_sq = mu2 ** 2
    mu1_mu2 = mu1 * mu2
    sigma1_sq = avg_conv(img1) - mu1_sq
    sigma2_sq = avg_conv(pan) - mu2_sq
    sigma12 = avg_conv(img1 * pan) - mu1_mu2
    s = sigma1_sq + sigma2_sq
    m = mu1_sq + mu2_sq
    m_safe = jnp.where(m > 1e-8, m, 1.0)
    s_safe = jnp.where(s > 1e-8, s, 1.0)
    q = jnp.ones_like(s)
    q = jnp.where((s < 1e-8) & (m > 1e-8), 2.0 * mu1_mu2 / m_safe, q)
    q = jnp.where((s > 1e-8) & (m < 1e-8), 2.0 * sigma12 / s_safe, q)
    q = jnp.where((s > 1e-8) & (m > 1e-8),
                  2.0 * mu1_mu2 * (2.0 * sigma12) / (m_safe * s_safe), q)
    return jnp.mean(q)


if __name__ == "__main__":
    key = jax.random.PRNGKey(0)

    # Test 1: single strip (small image, module-style 4D input, block_size=8).
    k1, k2 = jax.random.split(key)
    H = W = 32
    block_size = 8   # small averaging block for the self-test (module default is 32)
    img1 = jax.random.uniform(k1, (1, 1, H, W), dtype=jnp.float32)
    pan = jax.random.uniform(k2, (1, 1, H, W), dtype=jnp.float32)
    loss = uiqi_pan(img1, pan, block_size=block_size)
    jax.block_until_ready(loss)
    ref = _uiqi_pan_ref(img1, pan, block_size)
    # f32 MXU matmuls + different summation order are not bit-identical to the
    # naive shift-add conv; 2e-3 is ample slack for the q-index mean.
    assert jnp.allclose(loss, ref, atol=2e-3, rtol=2e-3), (loss, ref)

    # Test 2: multiple strips (exercises halo tails, row/col masking, parallel grid).
    k3, k4 = jax.random.split(k1)
    H2 = W2 = 64
    img1b = jax.random.uniform(k3, (H2, W2), dtype=jnp.float32)
    panb = jax.random.uniform(k4, (H2, W2), dtype=jnp.float32)
    loss2 = uiqi_pan(img1b, panb, block_size=8, tile_h=16)
    jax.block_until_ready(loss2)
    ref2 = _uiqi_pan_ref(img1b, panb, 8)
    assert jnp.allclose(loss2, ref2, atol=2e-3, rtol=2e-3), (loss2, ref2)

    print("KERNEL_OK")
</pallas_src>

<mosaic_0001>
module attributes {stable_mosaic.version = 11 : i64} {
  func.func @_uiqi_pan_kernel(%arg0: i32, %arg1: memref<2xf32, #tpu.memory_space<smem>>, %arg2: memref<40x128xf32, #tpu.memory_space<vmem>>, %arg3: memref<40x128xf32, #tpu.memory_space<vmem>>, %arg4: memref<1x8x128xf32, #tpu.memory_space<vmem>>, %arg5: memref<1x8x128xf32, #tpu.memory_space<vmem>>, %arg6: memref<40x48xf32, #tpu.memory_space<vmem>>, %arg7: memref<128x128xf32, #tpu.memory_space<vmem>>, %arg8: memref<8x128xf32, #tpu.memory_space<vmem>>, %arg9: memref<48x128xf32, #tpu.memory_space<vmem>>, %arg10: memref<48x128xf32, #tpu.memory_space<vmem>>) attributes {dimension_semantics = [#tpu.dimension_semantics<parallel>], iteration_bounds = array<i64: 1>, scalar_prefetch = 0 : i64, scratch_operands = 2 : i64, tpu.core_type = #tpu.core_type<tc>, window_params = [{transform_indices = @transform_0, window_bounds = array<i64: 2>}, {transform_indices = @transform_1, window_bounds = array<i64: 40, 128>}, {transform_indices = @transform_2, window_bounds = array<i64: 40, 128>}, {transform_indices = @transform_3, window_bounds = array<i64: 1, 8, 128>}, {transform_indices = @transform_4, window_bounds = array<i64: 1, 8, 128>}, {pipeline_mode = #tpu.pipeline_mode<synchronous>, transform_indices = @transform_5, window_bounds = array<i64: 40, 48>}, {pipeline_mode = #tpu.pipeline_mode<synchronous>, transform_indices = @transform_6, window_bounds = array<i64: 128, 128>}, {transform_indices = @transform_7, window_bounds = array<i64: 8, 128>}]} {
    %c0 = arith.constant 0 : index
    %0 = memref.load %arg1[%c0] : memref<2xf32, #tpu.memory_space<smem>>
    %c1 = arith.constant 1 : index
    %1 = memref.load %arg1[%c1] : memref<2xf32, #tpu.memory_space<smem>>
    %c0_0 = arith.constant 0 : index
    %c0_1 = arith.constant 0 : index
    %2 = vector.load %arg2[%c0_0, %c0_1] : memref<40x128xf32, #tpu.memory_space<vmem>>, vector<40x128xf32>
    %c0_2 = arith.constant 0 : index
    %c0_3 = arith.constant 0 : index
    %3 = vector.load %arg9[%c0_2, %c0_3] : memref<48x128xf32, #tpu.memory_space<vmem>>, vector<40x128xf32>
    tpu.vector_store %arg9[%c0_2, %c0_3], %2 {strides = array<i32>} : memref<48x128xf32, #tpu.memory_space<vmem>>, vector<40x128xf32>,
    %c0_4 = arith.constant 0 : index
    %c0_5 = arith.constant 0 : index
    %c0_6 = arith.constant 0 : index
    %4 = vector.load %arg4[%c0_4, %c0_5, %c0_6] : memref<1x8x128xf32, #tpu.memory_space<vmem>>, vector<1x8x128xf32>
    %5 = vector.shape_cast %4 : vector<1x8x128xf32> to vector<8x128xf32>
    %c40 = arith.constant 40 : index
    %c0_7 = arith.constant 0 : index
    %6 = vector.load %arg9[%c40, %c0_7] : memref<48x128xf32, #tpu.memory_space<vmem>>, vector<8x128xf32>
    tpu.vector_store %arg9[%c40, %c0_7], %5 {strides = array<i32>} : memref<48x128xf32, #tpu.memory_space<vmem>>, vector<8x128xf32>,
    %c0_8 = arith.constant 0 : index
    %c0_9 = arith.constant 0 : index
    %7 = vector.load %arg3[%c0_8, %c0_9] : memref<40x128xf32, #tpu.memory_space<vmem>>, vector<40x128xf32>
    %8 = vector.broadcast %0 : f32 to vector<40x128xf32>
    %9 = arith.mulf %7, %8 : vector<40x128xf32>
    %10 = vector.broadcast %1 : f32 to vector<40x128xf32>
    %11 = arith.addf %9, %10 : vector<40x128xf32>
    %c0_10 = arith.constant 0 : index
    %c0_11 = arith.constant 0 : index
    %12 = vector.load %arg10[%c0_10, %c0_11] : memref<48x128xf32, #tpu.memory_space<vmem>>, vector<40x128xf32>
    tpu.vector_store %arg10[%c0_10, %c0_11], %11 {strides = array<i32>} : memref<48x128xf32, #tpu.memory_space<vmem>>, vector<40x128xf32>,
    %c0_12 = arith.constant 0 : index
    %c0_13 = arith.constant 0 : index
    %c0_14 = arith.constant 0 : index
    %13 = vector.load %arg5[%c0_12, %c0_13, %c0_14] : memref<1x8x128xf32, #tpu.memory_space<vmem>>, vector<1x8x128xf32>
    %14 = vector.shape_cast %13 : vector<1x8x128xf32> to vector<8x128xf32>
    %15 = vector.broadcast %0 : f32 to vector<8x128xf32>
    %16 = arith.mulf %14, %15 : vector<8x128xf32>
    %17 = vector.broadcast %1 : f32 to vector<8x128xf32>
    %18 = arith.addf %16, %17 : vector<8x128xf32>
    %c40_15 = arith.constant 40 : index
    %c0_16 = arith.constant 0 : index
    %19 = vector.load %arg10[%c40_15, %c0_16] : memref<48x128xf32, #tpu.memory_space<vmem>>, vector<8x128xf32>
    tpu.vector_store %arg10[%c40_15, %c0_16], %18 {strides = array<i32>} : memref<48x128xf32, #tpu.memory_space<vmem>>, vector<8x128xf32>,
    %c0_17 = arith.constant 0 : index
    %c0_18 = arith.constant 0 : index
    %20 = vector.load %arg9[%c0_17, %c0_18] : memref<48x128xf32, #tpu.memory_space<vmem>>, vector<48x128xf32>
    %c0_19 = arith.constant 0 : index
    %c0_20 = arith.constant 0 : index
    %21 = vector.load %arg10[%c0_19, %c0_20] : memref<48x128xf32, #tpu.memory_space<vmem>>, vector<48x128xf32>
    %c0_21 = arith.constant 0 : index
    %c0_22 = arith.constant 0 : index
    %22 = vector.load %arg6[%c0_21, %c0_22] : memref<40x48xf32, #tpu.memory_space<vmem>>, vector<40x48xf32>
    %c0_23 = arith.constant 0 : index
    %c0_24 = arith.constant 0 : index
    %23 = vector.load %arg7[%c0_23, %c0_24] : memref<128x128xf32, #tpu.memory_space<vmem>>, vector<128x128xf32>
    %cst = arith.constant dense<0.000000e+00> : vector<40x128xf32>
    %24 = tpu.matmul %22, %20, %cst {dimension_numbers = #tpu.dot_dimension_numbers<[1], [0], [0], [1], [0, 0, 1, 1], [], []>, precision = #tpu.contract_precision<fp32>} : vector<40x48xf32>, vector<48x128xf32>, vector<40x128xf32> -> vector<40x128xf32>
    %cst_25 = arith.constant dense<0.000000e+00> : vector<40x128xf32>
    %25 = tpu.matmul %24, %23, %cst_25 {dimension_numbers = #tpu.dot_dimension_numbers<[1], [0], [0], [1], [0, 0, 1, 1], [], []>, precision = #tpu.contract_precision<fp32>} : vector<40x128xf32>, vector<128x128xf32>, vector<40x128xf32> -> vector<40x128xf32>
    %cst_26 = arith.constant 1.562500e-02 : f32
    %26 = vector.broadcast %cst_26 : f32 to vector<40x128xf32>
    %27 = arith.mulf %25, %26 : vector<40x128xf32>
    %cst_27 = arith.constant dense<0.000000e+00> : vector<40x128xf32>
    %28 = tpu.matmul %22, %21, %cst_27 {dimension_numbers = #tpu.dot_dimension_numbers<[1], [0], [0], [1], [0, 0, 1, 1], [], []>, precision = #tpu.contract_precision<fp32>} : vector<40x48xf32>, vector<48x128xf32>, vector<40x128xf32> -> vector<40x128xf32>
    %cst_28 = arith.constant dense<0.000000e+00> : vector<40x128xf32>
    %29 = tpu.matmul %28, %23, %cst_28 {dimension_numbers = #tpu.dot_dimension_numbers<[1], [0], [0], [1], [0, 0, 1, 1], [], []>, precision = #tpu.contract_precision<fp32>} : vector<40x128xf32>, vector<128x128xf32>, vector<40x128xf32> -> vector<40x128xf32>
    %cst_29 = arith.constant 1.562500e-02 : f32
    %30 = vector.broadcast %cst_29 : f32 to vector<40x128xf32>
    %31 = arith.mulf %29, %30 : vector<40x128xf32>
    %32 = arith.mulf %20, %21 : vector<48x128xf32>
    %cst_30 = arith.constant dense<0.000000e+00> : vector<40x128xf32>
    %33 = tpu.matmul %22, %32, %cst_30 {dimension_numbers = #tpu.dot_dimension_numbers<[1], [0], [0], [1], [0, 0, 1, 1], [], []>, precision = #tpu.contract_precision<fp32>} : vector<40x48xf32>, vector<48x128xf32>, vector<40x128xf32> -> vector<40x128xf32>
    %cst_31 = arith.constant dense<0.000000e+00> : vector<40x128xf32>
    %34 = tpu.matmul %33, %23, %cst_31 {dimension_numbers = #tpu.dot_dimension_numbers<[1], [0], [0], [1], [0, 0, 1, 1], [], []>, precision = #tpu.contract_precision<fp32>} : vector<40x128xf32>, vector<128x128xf32>, vector<40x128xf32> -> vector<40x128xf32>
    %cst_32 = arith.constant 1.562500e-02 : f32
    %35 = vector.broadcast %cst_32 : f32 to vector<40x128xf32>
    %36 = arith.mulf %34, %35 : vector<40x128xf32>
    %37 = arith.mulf %27, %27 : vector<40x128xf32>
    %38 = arith.mulf %31, %31 : vector<40x128xf32>
    %39 = arith.mulf %27, %31 : vector<40x128xf32>
    %40 = arith.subf %27, %37 : vector<40x128xf32>
    %41 = arith.subf %31, %38 : vector<40x128xf32>
    %42 = arith.subf %36, %39 : vector<40x128xf32>
    %43 = arith.addf %40, %41 : vector<40x128xf32>
    %44 = arith.addf %37, %38 : vector<40x128xf32>
    %cst_33 = arith.constant 9.99999993E-9 : f32
    %45 = vector.broadcast %cst_33 : f32 to vector<40x128xf32>
    %46 = arith.cmpf ogt, %44, %45 : vector<40x128xf32>
    %cst_34 = arith.constant 1.000000e+00 : f32
    %47 = vector.broadcast %cst_34 : f32 to vector<40x128xf32>
    %48 = arith.select %46, %44, %47 : vector<40x128xi1>, vector<40x128xf32>
    %cst_35 = arith.constant 9.99999993E-9 : f32
    %49 = vector.broadcast %cst_35 : f32 to vector<40x128xf32>
    %50 = arith.cmpf ogt, %43, %49 : vector<40x128xf32>
    %cst_36 = arith.constant 1.000000e+00 : f32
    %51 = vector.broadcast %cst_36 : f32 to vector<40x128xf32>
    %52 = arith.select %50, %43, %51 : vector<40x128xi1>, vector<40x128xf32>
    %cst_37 = arith.constant 1.000000e+00 : f32
    %53 = vector.broadcast %cst_37 : f32 to vector<40x128xf32>
    %cst_38 = arith.constant 9.99999993E-9 : f32
    %54 = vector.broadcast %cst_38 : f32 to vector<40x128xf32>
    %55 = arith.cmpf olt, %43, %54 : vector<40x128xf32>
    %cst_39 = arith.constant 9.99999993E-9 : f32
    %56 = vector.broadcast %cst_39 : f32 to vector<40x128xf32>
    %57 = arith.cmpf ogt, %44, %56 : vector<40x128xf32>
    %58 = arith.andi %55, %57 : vector<40x128xi1>
    %cst_40 = arith.constant 2.000000e+00 : f32
    %59 = vector.broadcast %cst_40 : f32 to vector<40x128xf32>
    %60 = arith.mulf %59, %39 : vector<40x128xf32>
    %61 = arith.divf %60, %48 : vector<40x128xf32>
    %62 = arith.select %58, %61, %53 : vector<40x128xi1>, vector<40x128xf32>
    %cst_41 = arith.constant 9.99999993E-9 : f32
    %63 = vector.broadcast %cst_41 : f32 to vector<40x128xf32>
    %64 = arith.cmpf ogt, %43, %63 : vector<40x128xf32>
    %cst_42 = arith.constant 9.99999993E-9 : f32
    %65 = vector.broadcast %cst_42 : f32 to vector<40x128xf32>
    %66 = arith.cmpf olt, %44, %65 : vector<40x128xf32>
    %67 = arith.andi %64, %66 : vector<40x128xi1>
    %cst_43 = arith.constant 2.000000e+00 : f32
    %68 = vector.broadcast %cst_43 : f32 to vector<40x128xf32>
    %69 = arith.mulf %68, %42 : vector<40x128xf32>
    %70 = arith.divf %69, %52 : vector<40x128xf32>
    %71 = arith.select %67, %70, %62 : vector<40x128xi1>, vector<40x128xf32>
    %cst_44 = arith.constant 9.99999993E-9 : f32
    %72 = vector.broadcast %cst_44 : f32 to vector<40x128xf32>
    %73 = arith.cmpf ogt, %43, %72 : vector<40x128xf32>
    %cst_45 = arith.constant 9.99999993E-9 : f32
    %74 = vector.broadcast %cst_45 : f32 to vector<40x128xf32>
    %75 = arith.cmpf ogt, %44, %74 : vector<40x128xf32>
    %76 = arith.andi %73, %75 : vector<40x128xi1>
    %cst_46 = arith.constant 2.000000e+00 : f32
    %77 = vector.broadcast %cst_46 : f32 to vector<40x128xf32>
    %78 = arith.mulf %77, %39 : vector<40x128xf32>
    %cst_47 = arith.constant 2.000000e+00 : f32
    %79 = vector.broadcast %cst_47 : f32 to vector<40x128xf32>
    %80 = arith.mulf %79, %42 : vector<40x128xf32>
    %81 = arith.mulf %78, %80 : vector<40x128xf32>
    %82 = arith.mulf %48, %52 : vector<40x128xf32>
    %83 = arith.divf %81, %82 : vector<40x128xf32>
    %84 = arith.select %76, %83, %71 : vector<40x128xi1>, vector<40x128xf32>
    %85 = tpu.iota {dimensions = array<i32: 0>} : vector<40x128xi32>
    %c40_i32 = arith.constant 40 : i32
    %86 = arith.muli %arg0, %c40_i32 : i32
    %87 = vector.broadcast %86 : i32 to vector<40x128xi32>
    %88 = arith.addi %85, %87 : vector<40x128xi32>
    %89 = tpu.iota {dimensions = array<i32: 1>} : vector<40x128xi32>
    %c33_i32 = arith.constant 33 : i32
    %90 = vector.broadcast %c33_i32 : i32 to vector<40x128xi32>
    %91 = arith.cmpi slt, %88, %90 : vector<40x128xi32>
    %c33_i32_48 = arith.constant 33 : i32
    %92 = vector.broadcast %c33_i32_48 : i32 to vector<40x128xi32>
    %93 = arith.cmpi slt, %89, %92 : vector<40x128xi32>
    %94 = arith.andi %91, %93 : vector<40x128xi1>
    %cst_49 = arith.constant 0.000000e+00 : f32
    %95 = vector.broadcast %cst_49 : f32 to vector<40x128xf32>
    %96 = arith.select %94, %84, %95 : vector<40x128xi1>, vector<40x128xf32>
    %97 = vector.shape_cast %96 : vector<40x128xf32> to vector<1x40x128xf32>
    %cst_50 = arith.constant dense<0.000000e+00> : vector<1xf32>
    %98 = vector.multi_reduction <add>, %97, %cst_50 [1, 2] : vector<1x40x128xf32> to vector<1xf32>
    %99 = vector.shape_cast %98 : vector<1xf32> to vector<1x1x1xf32>
    %100 = vector.extract %99[0, 0, 0] : f32 from vector<1x1x1xf32>
    %101 = tpu.iota {dimensions = array<i32: 0>} : vector<8x128xi32>
    %102 = tpu.iota {dimensions = array<i32: 1>} : vector<8x128xi32>
    %c0_i32 = arith.constant 0 : i32
    %103 = vector.broadcast %c0_i32 : i32 to vector<8x128xi32>
    %104 = arith.cmpi eq, %101, %103 : vector<8x128xi32>
    %c0_i32_51 = arith.constant 0 : i32
    %105 = vector.broadcast %c0_i32_51 : i32 to vector<8x128xi32>
    %106 = arith.cmpi eq, %102, %105 : vector<8x128xi32>
    %107 = arith.andi %104, %106 : vector<8x128xi1>
    %cst_52 = arith.constant 0.000000e+00 : f32
    %108 = vector.broadcast %100 : f32 to vector<8x128xf32>
    %109 = vector.broadcast %cst_52 : f32 to vector<8x128xf32>
    %110 = arith.select %107, %108, %109 : vector<8x128xi1>, vector<8x128xf32>
    %c0_53 = arith.constant 0 : index
    %c0_54 = arith.constant 0 : index
    %111 = vector.load %arg8[%c0_53, %c0_54] : memref<8x128xf32, #tpu.memory_space<vmem>>, vector<8x128xf32>
    tpu.vector_store %arg8[%c0_53, %c0_54], %110 {strides = array<i32>} : memref<8x128xf32, #tpu.memory_space<vmem>>, vector<8x128xf32>,
    return
  }
  func.func @transform_0(%arg0: i32) -> i32 {
    %c0_i32 = arith.constant 0 : i32
    %c0_i32_0 = arith.constant 0 : i32
    return %c0_i32 : i32
  }
  func.func @transform_1(%arg0: i32) -> (i32, i32) {
    %c0_i32 = arith.constant 0 : i32
    %c0_i32_0 = arith.constant 0 : i32
    return %arg0, %c0_i32 : i32, i32
  }
  func.func @transform_2(%arg0: i32) -> (i32, i32) {
    %c0_i32 = arith.constant 0 : i32
    %c0_i32_0 = arith.constant 0 : i32
    return %arg0, %c0_i32 : i32, i32
  }
  func.func @transform_3(%arg0: i32) -> (i32, i32, i32) {
    %c0_i32 = arith.constant 0 : i32
    %c0_i32_0 = arith.constant 0 : i32
    %c0_i32_1 = arith.constant 0 : i32
    return %arg0, %c0_i32, %c0_i32_0 : i32, i32, i32
  }
  func.func @transform_4(%arg0: i32) -> (i32, i32, i32) {
    %c0_i32 = arith.constant 0 : i32
    %c0_i32_0 = arith.constant 0 : i32
    %c0_i32_1 = arith.constant 0 : i32
    return %arg0, %c0_i32, %c0_i32_0 : i32, i32, i32
  }
  func.func @transform_5(%arg0: i32) -> (i32, i32) {
    %c0_i32 = arith.constant 0 : i32
    %c0_i32_0 = arith.constant 0 : i32
    %c0_i32_1 = arith.constant 0 : i32
    return %c0_i32, %c0_i32_0 : i32, i32
  }
  func.func @transform_6(%arg0: i32) -> (i32, i32) {
    %c0_i32 = arith.constant 0 : i32
    %c0_i32_0 = arith.constant 0 : i32
    %c0_i32_1 = arith.constant 0 : i32
    return %c0_i32, %c0_i32_0 : i32, i32
  }
  func.func @transform_7(%arg0: i32) -> (i32, i32) {
    %c0_i32 = arith.constant 0 : i32
    %c0_i32_0 = arith.constant 0 : i32
    return %arg0, %c0_i32 : i32, i32
  }
}

</mosaic_0001>

<bundles_post_ra>
// kernel: tpu_custom_call.1
= control target key start
LH: loop header
LB: loop body
LE: loop exit
PB: predicated region body
PF: predicated region fallthrough
CT: control target
= control target key end

     0   :  { %12 = vsyncpa [#allocation7], 0  ;;  %s10095_s0 = inlined_call_operand.hbm [shape: f32[2], index: 0, kind: input, shape index: {}]   ;;  %s10096_s1 = inlined_call_operand.hbm [shape: f32[40,128], index: 1, kind: input, shape index: {}]   ;;  %s10097_s2 = inlined_call_operand.hbm [shape: f32[40,128], index: 2, kind: input, shape index: {}]   ;;  %s10098_s3 = inlined_call_operand.vmem [shape: f32[1,8,128], index: 3, kind: input, shape index: {}]   ;;  %s10099_s4 = inlined_call_operand.hbm [shape: f32[1,8,128], index: 4, kind: input, shape index: {}]   ;;  %s10100_s5 = inlined_call_operand.hbm [shape: f32[40,48], index: 5, kind: input, shape index: {}]   ;;  %s10101_s6 = inlined_call_operand.hbm [shape: f32[128,128], index: 6, kind: input, shape index: {}]   ;;  %s10102_s7 = inlined_call_operand.hbm [shape: f32[8,128], index: 7, kind: output, shape index: {}]  }
   0x1   :  { %13 = vsyncpa [#allocation5], 0 }
   0x2   :  { %14 = vsyncpa [#allocation10], 0 }
   0x3   :  { %15 = vsyncpa [#allocation13], 0 }
   0x4   :  { %16 = vsyncpa [#allocation6], 0  ;;  %s7909_s24 = smov [#allocation9]   ;;  %s7910_s26 = smov [#allocation12]  }
   0x5   :  { %s42_s25 = sshll.u32 %s7909_s24, 4  ;;  %s66_s27 = sshll.u32 %s7910_s26, 4  ;;  %s43_s25 = int_to_ptr.vmem [resolvable:$true] %s42_s25  ;;  %s7961_s27 = int_to_ptr.vmem [resolvable:$true] %s66_s27 }
   0x6   :  { %s7757_s30 = scalar_lea.hbm %s10097_s2, 640 }
   0x7   :  { %p7758_p0 = scmp.ne.s32.totalorder %s10097_s2, %s7757_s30  ;;  %p7761_p1 = scmp.lt.u32.totalorder %s7757_s30, %s10097_s2 }
   0x9   :  { %p7763_p2 = pnand %p7761_p1, %p7758_p0 }
   0xb   :  { %7766 = shalt.err (!%p7763_p2)
}
   0xc   :  { %s7767_s12 = scalar_lea.vmem %s43_s25, 640  ;;  %p7772_p4 = scmp.lt.s32.totalorder %s43_s25, %s43_s25 }
   0xd   :  { %p7768_p3 = scmp.ne.s32.totalorder %s43_s25, %s7767_s12  ;;  %p7773_p5 = scmp.lt.s32.totalorder %s7767_s12, %s7767_s12 }
   0xf   :  { %p7774_p6 = por %p7773_p5, %p7772_p4 }
  0x11   :  { %p7775_p7 = pnand %p7774_p6, %p7768_p3 }
  0x13   :  { %7778 = shalt.err (!%p7775_p7)
}
  0x14   :  { %s7911_s13 = smov 128   ;;  %s7912_s14 = smov 8  }
  0x15   :  { %48 = dma.hbm_to_vmem [thread:$0]  %s10097_s2, 640, %s43_s25, [#allocation10], %s7911_s13, %s7911_s13, %s7912_s14  }
  0x16   :  { %s7779_s19 = scalar_lea.hbm %s10100_s5, 640 }
  0x17   :  { %p7780_p8 = scmp.ne.s32.totalorder %s10100_s5, %s7779_s19  ;;  %p7783_p9 = scmp.lt.u32.totalorder %s7779_s19, %s10100_s5 }
  0x19   :  { %p7785_p10 = pnand %p7783_p9, %p7780_p8 }
  0x1b   :  { %7788 = shalt.err (!%p7785_p10)
}
  0x1c   :  { %s7789_s24 = scalar_lea.vmem %s7961_s27, 640  ;;  %p7794_p12 = scmp.lt.s32.totalorder %s7961_s27, %s7961_s27 }
  0x1d   :  { %p7790_p11 = scmp.ne.s32.totalorder %s7961_s27, %s7789_s24  ;;  %p7795_p13 = scmp.lt.s32.totalorder %s7789_s24, %s7789_s24 }
  0x1f   :  { %p7796_p0 = por %p7795_p13, %p7794_p12 }
  0x21   :  { %p7797_p1 = pnand %p7796_p0, %p7790_p11 }
  0x23   :  { %7800 = shalt.err (!%p7797_p1)
}
  0x24   :  { %72 = dma.hbm_to_vmem [thread:$0]  %s10100_s5, 640, %s7961_s27, [#allocation13], %s7911_s13, %s7911_s13, %s7912_s14  }
  0x25   :  { %s7801_s29 = scalar_lea.hbm %s10095_s0, 16 }
  0x26   :  { %p7802_p2 = scmp.ne.s32.totalorder %s10095_s0, %s7801_s29  ;;  %p7805_p3 = scmp.lt.u32.totalorder %s7801_s29, %s10095_s0 }
  0x28   :  { %p7807_p4 = pnand %p7805_p3, %p7802_p2 }
  0x2a   :  { %7810 = shalt.err (!%p7807_p4)
}
  0x2b   :  { %s7913_s11 = smov [#allocation4]   ;;  %s7914_s5 = smov [#allocation8]  }
  0x2c   :  { %24 = dma.hbm_to_smem %s10095_s0, 16, %s7913_s11, [#allocation7]  }
  0x2d   :  { %s30_s27 = sshll.u32 %s7914_s5, 4  ;;  %s7915_s16 = smov [#allocation11]   ;;  %s31_s27 = int_to_ptr.vmem [resolvable:$true] %s30_s27 }
  0x2e   :  { %s57_s17 = sshll.u32 %s7915_s16, 4  ;;  %s7811_s20 = scalar_lea.hbm %s10096_s1, 640  ;;  %s58_s17 = int_to_ptr.vmem [resolvable:$true] %s57_s17 }
  0x2f   :  { %p7812_p5 = scmp.ne.s32.totalorder %s10096_s1, %s7811_s20  ;;  %p7815_p6 = scmp.lt.u32.totalorder %s7811_s20, %s10096_s1 }
  0x31   :  { %p7817_p7 = pnand %p7815_p6, %p7812_p5 }
  0x33   :  { %7820 = shalt.err (!%p7817_p7)
}
  0x34   :  { %s7821_s0 = scalar_lea.vmem %s31_s27, 640  ;;  %p7826_p9 = scmp.lt.s32.totalorder %s31_s27, %s31_s27 }
  0x35   :  { %p7822_p8 = scmp.ne.s32.totalorder %s31_s27, %s7821_s0  ;;  %p7827_p10 = scmp.lt.s32.totalorder %s7821_s0, %s7821_s0 }
  0x37   :  { %p7828_p11 = por %p7827_p10, %p7826_p9 }
  0x39   :  { %p7829_p12 = pnand %p7828_p11, %p7822_p8 }
  0x3b   :  { %7832 = shalt.err (!%p7829_p12)
}
  0x3c   :  { %36 = dma.hbm_to_vmem [thread:$0]  %s10096_s1, 640, %s31_s27, [#allocation5], %s7911_s13, %s7911_s13, %s7912_s14  }
  0x3d   :  { %s7833_s29 = scalar_lea.hbm %s10099_s4, 128 }
  0x3e   :  { %p7834_p13 = scmp.ne.s32.totalorder %s10099_s4, %s7833_s29  ;;  %p7837_p0 = scmp.lt.u32.totalorder %s7833_s29, %s10099_s4 }
  0x40   :  { %p7839_p1 = pnand %p7837_p0, %p7834_p13 }
  0x42   :  { %7842 = shalt.err (!%p7839_p1)
}
  0x43   :  { %s7843_s11 = scalar_lea.vmem %s58_s17, 128  ;;  %p7848_p3 = scmp.lt.s32.totalorder %s58_s17, %s58_s17 }
  0x44   :  { %p7844_p2 = scmp.ne.s32.totalorder %s58_s17, %s7843_s11  ;;  %p7849_p4 = scmp.lt.s32.totalorder %s7843_s11, %s7843_s11 }
  0x46   :  { %p7850_p5 = por %p7849_p4, %p7848_p3 }
  0x48   :  { %p7851_p6 = pnand %p7850_p5, %p7844_p2 }
  0x4a   :  { %7854 = shalt.err (!%p7851_p6)
}
  0x4b   :  { %60 = dma.hbm_to_vmem [thread:$0]  %s10099_s4, 128, %s58_s17, [#allocation10]  }
  0x4c   :  { %s7916_s15 = smov [#allocation14]   ;;  %s7855_s18 = scalar_lea.hbm %s10101_s6, 2048 }
  0x4d   :  { %s78_s5 = sshll.u32 %s7916_s15, 4  ;;  %p7856_p7 = scmp.ne.s32.totalorder %s10101_s6, %s7855_s18  ;;  %s79_s5 = int_to_ptr.vmem [resolvable:$true] %s78_s5 }
  0x4e   :  { %p7859_p8 = scmp.lt.u32.totalorder %s7855_s18, %s10101_s6 }
  0x50   :  { %p7861_p9 = pnand %p7859_p8, %p7856_p7 }
  0x52   :  { %7864 = shalt.err (!%p7861_p9)
}
  0x53   :  { %s7865_s23 = scalar_lea.vmem %s79_s5, 2048  ;;  %p7870_p11 = scmp.lt.s32.totalorder %s79_s5, %s79_s5 }
  0x54   :  { %p7866_p10 = scmp.ne.s32.totalorder %s79_s5, %s7865_s23  ;;  %p7871_p12 = scmp.lt.s32.totalorder %s7865_s23, %s7865_s23 }
  0x56   :  { %p7872_p13 = por %p7871_p12, %p7870_p11 }
  0x58   :  { %p7873_p0 = pnand %p7872_p13, %p7866_p10 }
  0x5a   :  { %7876 = shalt.err (!%p7873_p0)
}
  0x5b   :  { %84 = dma.hbm_to_vmem [thread:$0]  %s10101_s6, 2048, %s79_s5, [#allocation13], %s7911_s13, %s7911_s13, %s7912_s14  }
  0x5c   :  { %7899 = dma.done.wait [#allocation7], 16  }
  0x5d   :  { %7900 = vsyncadd [#allocation7], 4294967280 }
  0x5e   :  { %7901 = dma.done.wait [#allocation5], 640  }
  0x5f   :  { %7902 = vsyncadd [#allocation5], 4294966656 }
  0x60   :  { %7903 = dma.done.wait [#allocation10], 768  }
  0x61   :  { %7904 = vsyncadd [#allocation10], 4294966528 }
  0x62   :  { %7905 = dma.done.wait [#allocation13], 2688  }
  0x63   :  { %7906 = vsyncadd [#allocation13], 4294964608 }
  0x64   :  { %103 = sfence }
  0x65   :  { %v8052_v0 = vld [vmem:[#allocation8] sm:$0xff]  ;;  %v8054_v1 = vld [vmem:[#allocation8 + $0x8] sm:$0xff]  ;;  %v8056_v2 = vld [vmem:[#allocation8 + $0x10] sm:$0xff]  ;;  %v10123_v3 = vmov 0.0|0.0   ;;  %vm7918_vm0 = vmmov 0   ;;  %v10121_v10 = vmov 0.0  }
  0x66   :  { %6838 = vmatprep.subr.bf16.mxu0 %v10123_v3  ;;  %v194_v4 = vand.u32 4294901760, %v8052_v0  ;;  %v197_v5 = vand.u32 4294901760, %v8054_v1  ;;  %v8061_v6 = vld [vmem:[#allocation8 + $0x18] sm:$0xff]  ;;  %v200_v7 = vand.u32 4294901760, %v8056_v2  ;;  %v8064_v8 = vld [vmem:[#allocation8 + $0x20] sm:$0xff]  ;;  %5536 = vmatprep.mubr.msk.f32.mxu0 %vm7918_vm0, %v10121_v10  ;;  %vm177_vm1 = vcmask 392192  }
  0x67   :  { %v8069_v9 = vld [vmem:[%s10098_s3] sm:$0xff]  ;;  %v203_v11 = vand.u32 4294901760, %v8061_v6  ;;  %v206_v12 = vand.u32 4294901760, %v8064_v8  ;;  %6829 = vmatprep.subr.bf16.mxu1 %v10123_v3  ;;  %5509 = vmatprep.mubr.msk.f32.mxu1 %vm7918_vm0, %v10121_v10  ;;  %v157_v37 = vld [vmem:[#allocation12 + $0x8] sm:$0xff]  ;;  %v158_v46 = vld [vmem:[#allocation12 + $0x10] sm:$0xff]  ;;  %s104_s3 = sld [smem:[#allocation4]] }
  0x68   :  { %v209_v13 = vand.u32 4294901760, %v8069_v9  ;;  %v8080_v14 = vsub.f32 %v8052_v0, %v194_v4  ;;  %v8083_v15 = vsub.f32 %v8054_v1, %v197_v5  ;;  %v8086_v16 = vsub.f32 %v8056_v2, %v200_v7  ;;  %v156_v23 = vld [vmem:[#allocation12] sm:$0xff]  ;;  %v159_v53 = vld [vmem:[#allocation12 + $0x18] sm:$0xff]  ;;  %s4920_s14 = sld [smem:[#allocation4 + $0x1]]  ;;  %s7920_s24 = smov [#allocation15]  }
  0x69   :  { %v8089_v17 = vsub.f32 %v8061_v6, %v203_v11  ;;  %v8092_v18 = vsub.f32 %v8064_v8, %v206_v12  ;;  %v179_v32 = vsel %vm177_vm1, %v156_v23, 0  ;;  %v182_v41 = vsel %vm177_vm1, %v157_v37, 0  ;;  %v160_v61 = vld [vmem:[#allocation12 + $0x20] sm:$0xff]  ;;  %s4908_s0 = sshll.u32 %s7920_s24, 4  ;;  %s4909_s0 = int_to_ptr.vmem [resolvable:$true] %s4908_s0 }
  0x6a   :  { %v8095_v19 = vsub.f32 %v8069_v9, %v209_v13  ;;  %v317_v20 = vand.u32 4294901760, %v8080_v14  ;;  %v324_v21 = vand.u32 4294901760, %v8083_v15  ;;  %v331_v22 = vand.u32 4294901760, %v8086_v16  ;;  %s7877_s25 = scalar_lea.vmem %s4909_s0, 128  ;;  %p7882_p2 = scmp.lt.s32.totalorder %s4909_s0, %s4909_s0 }
  0x6b   :  { %v338_v24 = vand.u32 4294901760, %v8089_v17  ;;  %v345_v25 = vand.u32 4294901760, %v8092_v18  ;;  %v8122_v40 = vand.u32 4294901760, %v179_v32  ;;  %v8125_v45 = vpack.c.bf16 %v197_v5, %v194_v4  ;;  %p7878_p1 = scmp.ne.s32.totalorder %s4909_s0, %s7877_s25  ;;  %p7883_p3 = scmp.lt.s32.totalorder %s7877_s25, %s7877_s25 }
  0x6c   :  { %v352_v26 = vand.u32 4294901760, %v8095_v19  ;;  %v318_v27 = vsub.f32 %v8080_v14, %v317_v20  ;;  %v325_v28 = vsub.f32 %v8083_v15, %v324_v21  ;;  %v332_v29 = vsub.f32 %v8086_v16, %v331_v22 }
  0x6d   :  { %v339_v30 = vsub.f32 %v8089_v17, %v338_v24  ;;  %v346_v31 = vsub.f32 %v8092_v18, %v345_v25  ;;  %v8129_v47 = vsub.f32 %v179_v32, %v8122_v40  ;;  %6831 = vmatpush3.bf16.msra.mxu1 %v8125_v45  ;;  %v8132_v48 = vand.u32 4294901760, %v182_v41  ;;  %p7884_p4 = por %p7883_p3, %p7882_p2 }
  0x6e   :  { %v319_v33 = vand.u32 4294901760, %v318_v27  ;;  %v326_v34 = vand.u32 4294901760, %v325_v28  ;;  %v333_v35 = vand.u32 4294901760, %v332_v29  ;;  %v353_v36 = vsub.f32 %v8095_v19, %v352_v26  ;;  %6832 = vmatprep.subr.bf16.mxu1 %v10123_v3 }
  0x6f   :  { %v340_v38 = vand.u32 4294901760, %v339_v30  ;;  %v347_v43 = vand.u32 4294901760, %v346_v31  ;;  %v8135_v49 = vand.u32 4294901760, %v8129_v47  ;;  %v185_v51 = vsel %vm177_vm1, %v158_v46, 0  ;;  %p7885_p5 = pnand %p7884_p4, %p7878_p1 }
  0x70   :  { %v6839_v39 = vpack.c.bf16 %v326_v34, %v319_v33  ;;  %v354_v44 = vand.u32 4294901760, %v353_v36  ;;  %v8139_v52 = vpack.c.bf16 %v203_v11, %v200_v7  ;;  %v8143_v54 = vsub.f32 %v182_v41, %v8132_v48 }
  0x71   :  { %v6842_v42 = vpack.c.bf16 %v340_v38, %v333_v35  ;;  %v267_v55 = vsub.f32 %v8129_v47, %v8135_v49  ;;  %v8148_v56 = vand.u32 4294901760, %v185_v51  ;;  %v6848_v58 = vpack.c.bf16 %v8083_v15, %v8080_v14  ;;  %v118_v38 = vld [vmem:[#allocation9] sm:$0xff] }
  0x72   :  { %6840 = vmatpush3.bf16.msra.mxu0 %v6839_v39  ;;  %v6845_v50 = vpack.c.bf16 %v354_v44, %v347_v43  ;;  %6834 = vmatpush3.bf16.msra.mxu1 %v8139_v52  ;;  %v8151_v57 = vand.u32 4294901760, %v8143_v54  ;;  %v188_v59 = vsel %vm177_vm1, %v159_v53, 0  ;;  %v8157_v60 = vpack.c.bf16 %v209_v13, %v206_v12  ;;  %v119_v39 = vld [vmem:[#allocation9 + $0x8] sm:$0xff]  ;;  %v120_v44 = vld [vmem:[#allocation9 + $0x10] sm:$0xff] }
  0x73   :  { %6841 = vmatprep.subr.bf16.mxu0 %v10123_v3  ;;  %6835 = vmatprep.subr.bf16.mxu1 %v10123_v3  ;;  %v8161_v62 = vsub.f32 %v185_v51, %v8148_v56  ;;  %v8163_v63 = vand.u32 4294901760, %v267_v55  ;;  %v8169_v5 = vand.u32 4294901760, %v188_v59  ;;  %v6851_v11 = vpack.c.bf16 %v8089_v17, %v8086_v16 }
  0x74   :  { %v277_v4 = vsub.f32 %v8143_v54, %v8151_v57  ;;  %v191_v12 = vsel %vm177_vm1, %v160_v61, 0  ;;  %v6854_v30 = vpack.c.bf16 %v8095_v19, %v8092_v18  ;;  %v123_v41 = vstv %s104_s3  ;;  %v140_v61 = vld [vmem:[#allocation11] sm:$0xff] }
  0x75   :  { %v8172_v7 = vand.u32 4294901760, %v8161_v62  ;;  %v8182_v13 = vsub.f32 %v188_v59, %v8169_v5  ;;  %v8192_v28 = vand.u32 4294901760, %v191_v12  ;;  %v125_v43 = vmul.f32 %v123_v41, %v119_v39  ;;  %v122_v59 = vld [vmem:[#allocation9 + $0x20] sm:$0xff] }
  0x76   :  { %6843 = vmatpush3.bf16.msra.mxu0 %v6842_v42  ;;  %6837 = vmatpush3.bf16.msra.mxu1 %v8157_v60  ;;  %v8185_v23 = vand.u32 4294901760, %v277_v4  ;;  %v124_v42 = vmul.f32 %v123_v41, %v118_v38  ;;  %v129_v46 = vstv %s4920_s14  ;;  %v126_v51 = vmul.f32 %v123_v41, %v120_v44 }
  0x77   :  { %6844 = vmatprep.subr.bf16.mxu0 %v10123_v3  ;;  %10178 = vst [vmem:[#allocation21_spill] sm:$0xff] %v8172_v7  ;;  %6883 = vmatprep.subr.bf16.mxu1 %v10123_v3  ;;  %v287_v27 = vsub.f32 %v8161_v62, %v8172_v7  ;;  %v8195_v29 = vand.u32 4294901760, %v8182_v13  ;;  %v8203_v31 = vsub.f32 %v191_v12, %v8192_v28 }
  0x78   :  { %v8250_v53 = vadd.f32 %v129_v46, %v124_v42  ;;  %v8252_v55 = vadd.f32 %v129_v46, %v125_v43  ;;  %v8259_v4 = vadd.f32 %v129_v46, %v126_v51  ;;  %v6866_v44 = vpack.c.bf16 %v324_v21, %v317_v20 }
  0x79   :  { %5510 = vmatmul.mubr.f32.vlgmr.msra.gmra.mrb[0].mxu1 %v8163_v63  ;;  %v8206_v32 = vand.u32 4294901760, %v287_v27  ;;  %v297_v33 = vsub.f32 %v8182_v13, %v8195_v29  ;;  %v8214_v34 = vand.u32 4294901760, %v8203_v31  ;;  %v6869_v15 = vpack.c.bf16 %v338_v24, %v331_v22 }
  0x7a   :  { %6846 = vmatpush3.bf16.msra.mxu0 %v6845_v50  ;;  %5512 = vmatprep.mubr.msk.f32.mxu1 %vm7918_vm0, %v10121_v10  ;;  %v121_v50 = vld [vmem:[#allocation9 + $0x18] sm:$0xff]  ;;  %v1695_v12 = vand.u32 4294901760, %v8250_v53  ;;  %v1698_v27 = vand.u32 4294901760, %v8252_v55  ;;  %v1701_v39 = vand.u32 4294901760, %v8259_v4  ;;  %v6872_v17 = vpack.c.bf16 %v352_v26, %v345_v25 }
  0x7b   :  { %6847 = vmatprep.subr.bf16.mxu0 %v10123_v3  ;;  %v8220_v35 = vand.u32 4294901760, %v297_v33  ;;  %v307_v36 = vsub.f32 %v8203_v31, %v8214_v34  ;;  %v141_v33 = vmul.f32 %v140_v61, %v123_v41 }
  0x7c   :  { %v8276_v38 = vsub.f32 %v8252_v55, %v1698_v27  ;;  %v8368_v18 = vpack.c.bf16 %v1698_v27, %v1695_v12 }
  0x7d   :  { %5537 = vmatmul.mubr.f32.vlgmr.msra.gmra.mrb[0].mxu0 %v8122_v40  ;;  %5513 = vmatmul.mubr.f32.gmra.mrb[2].mxu1 %v8185_v23  ;;  %v8230_v37 = vand.u32 4294901760, %v307_v36  ;;  %v8271_v36 = vsub.f32 %v8250_v53, %v1695_v12  ;;  %v8282_v43 = vadd.f32 %v141_v33, %v129_v46 }
  0x7e   :  { %6849 = vmatpush3.bf16.msra.mxu0 %v6848_v58  ;;  %5539 = vmatprep.mubr.msk.f32.mxu0 %vm7918_vm0, %v10121_v10  ;;  %v127_v58 = vmul.f32 %v123_v41, %v121_v50  ;;  %v8292_v50 = vsub.f32 %v8259_v4, %v1701_v39 }
  0x7f   :  { %6850 = vmatprep.subr.bf16.mxu0 %v10123_v3  ;;  %5515 = vmatprep.mubr.msk.f32.mxu1 %vm7918_vm0, %v10121_v10  ;;  %v1710_v14 = vand.u32 4294901760, %v8282_v43 }
  0x81   :  { %5540 = vmatmul.mubr.f32.gmra.mrb[2].mxu0 %v8132_v48  ;;  %5516 = vmatmul.mubr.f32.gmra.mrb[4].mxu1 %v8206_v32  ;;  %v8314_v21 = vsub.f32 %v8282_v43, %v1710_v14 }
  0x82   :  { %5542 = vmatprep.mubr.msk.f32.mxu0 %vm7918_vm0, %v10121_v10  ;;  %6852 = vmatpush3.bf16.msra.mxu0 %v6851_v11  ;;  %v128_v11 = vmul.f32 %v123_v41, %v122_v59 }
  0x83   :  { %6853 = vmatprep.subr.bf16.mxu0 %v10123_v3  ;;  %5518 = vmatprep.mubr.msk.f32.mxu1 %vm7918_vm0, %v10121_v10  ;;  %v1853_v24 = vand.u32 4294901760, %v8314_v21 }
  0x84   :  { %v8280_v41 = vadd.f32 %v129_v46, %v128_v11  ;;  %v1832_v11 = vand.u32 4294901760, %v8292_v50 }
  0x85   :  { %5543 = vmatmul.mubr.f32.gmra.mrb[4].mxu0 %v8148_v56  ;;  %5519 = vmatmul.mubr.f32.gmra.mrb[6].mxu1 %v8220_v35 }
  0x86   :  { %5545 = vmatprep.mubr.msk.f32.mxu0 %vm7918_vm0, %v10121_v10  ;;  %6855 = vmatpush3.bf16.msra.mxu0 %v6854_v30  ;;  %v8263_v30 = vadd.f32 %v129_v46, %v127_v58  ;;  %v1818_v58 = vand.u32 4294901760, %v8271_v36  ;;  %v1825_v46 = vand.u32 4294901760, %v8276_v38  ;;  %v1707_v59 = vand.u32 4294901760, %v8280_v41 }
  0x87   :  { %6856 = vmatprep.subr.bf16.mxu0 %v10123_v3  ;;  %5521 = vmatprep.mubr.msk.f32.mxu1 %vm7918_vm0, %v10121_v10 }
  0x88   :  { %v1704_v42 = vand.u32 4294901760, %v8263_v30  ;;  %v8301_v61 = vpack.c.bf16 %v1825_v46, %v1818_v58  ;;  %v8311_v20 = vsub.f32 %v8280_v41, %v1707_v59  ;;  %v8381_v25 = vpack.c.bf16 %v1710_v14, %v1707_v59 }
  0x89   :  { %5546 = vmatmul.mubr.f32.gmra.mrb[6].mxu0 %v8169_v5  ;;  %5522 = vmatmul.mubr.f32.gmra.mrb[8].mxu1 %v8230_v37  ;;  %v1819_v26 = vsub.f32 %v8271_v36, %v1818_v58  ;;  %v1854_v59 = vsub.f32 %v8314_v21, %v1853_v24 }
  0x8a   :  { %5548 = vmatprep.mubr.msk.f32.mxu0 %vm7918_vm0, %v10121_v10  ;;  %5691 = vmatprep.mubr.msk.f32.mxu1 %vm7918_vm0, %v10121_v10  ;;  %v8295_v51 = vsub.f32 %v8263_v30, %v1704_v42  ;;  %v1846_v22 = vand.u32 4294901760, %v8311_v20  ;;  %v8374_v19 = vpack.c.bf16 %v1704_v42, %v1701_v39 }
  0x8c   :  { %v1839_v33 = vand.u32 4294901760, %v8295_v51 }
  0x8d   :  { %5549 = vmatmul.mubr.f32.gmra.mrb[8].mxu0 %v8192_v28 }
  0x8e   :  { %5563 = vmatprep.mubr.msk.f32.mxu0 %vm7918_vm0, %v10121_v10  ;;  %v8319_v16 = vpack.c.bf16 %v1839_v33, %v1832_v11  ;;  %v1840_v27 = vsub.f32 %v8295_v51, %v1839_v33 }
  0x90   :  { %v1841_v58 = vand.u32 4294901760, %v1840_v27  ;;  %v8485_v27 = vmul.f32 %v8252_v55, %v8054_v1  ;;  %v8510_v55 = vmul.f32 %v8259_v4, %v8056_v2 }
  0x91   :  { %5564 = vmatmul.mubr.f32.vlgmr.msra.gmra.mrb[0].mxu0 %v8129_v47 }
  0x92   :  { %6858 = vmatpush3.bf16.msra.mxu0 %v8125_v45  ;;  %5566 = vmatprep.mubr.msk.f32.mxu0 %vm7918_vm0, %v10121_v10 }
  0x93   :  { %6859 = vmatprep.subr.bf16.mxu0 %v10123_v3 }
  0x95   :  { %5567 = vmatmul.mubr.f32.gmra.mrb[2].mxu0 %v8143_v54 }
  0x96   :  { %5569 = vmatprep.mubr.msk.f32.mxu0 %vm7918_vm0, %v10121_v10  ;;  %6861 = vmatpush3.bf16.msra.mxu0 %v8139_v52 }
  0x97   :  { %6862 = vmatprep.subr.bf16.mxu0 %v10123_v3 }
  0x99   :  { %5570 = vmatmul.mubr.f32.gmra.mrb[4].mxu0 %v8161_v62 }
  0x9a   :  { %5572 = vmatprep.mubr.msk.f32.mxu0 %vm7918_vm0, %v10121_v10  ;;  %6864 = vmatpush3.bf16.msra.mxu0 %v8157_v60 }
  0x9b   :  { %6865 = vmatprep.subr.bf16.mxu0 %v10123_v3 }
  0x9d   :  { %5573 = vmatmul.mubr.f32.gmra.mrb[6].mxu0 %v8182_v13 }
  0x9e   :  { %5575 = vmatprep.mubr.msk.f32.mxu0 %vm7918_vm0, %v10121_v10 }
  0xa1   :  { %5576 = vmatmul.mubr.f32.gmra.mrb[8].mxu0 %v8203_v31 }
  0xa2   :  { %5590 = vmatprep.mubr.msk.f32.mxu0 %vm7918_vm0, %v10121_v10 }
  0xa5   :  { %5591 = vmatmul.mubr.f32.vlgmr.msra.gmra.mrb[0].mxu0 %v8135_v49 }
  0xa6   :  { %6867 = vmatpush3.bf16.msra.mxu0 %v6866_v44  ;;  %5593 = vmatprep.mubr.msk.f32.mxu0 %vm7918_vm0, %v10121_v10  ;;  %v8331_v44 = vpack.c.bf16 %v1853_v24, %v1846_v22  ;;  %v8460_v24 = vld [vmem:[#allocation14 + $0x10] sm:$0xff] }
  0xa7   :  { %6868 = vmatprep.subr.bf16.mxu0 %v10123_v3 }
  0xa9   :  { %5594 = vmatmul.mubr.f32.gmra.mrb[2].mxu0 %v8151_v57 }
  0xaa   :  { %5596 = vmatprep.mubr.msk.f32.mxu0 %vm7918_vm0, %v10121_v10  ;;  %6870 = vmatpush3.bf16.msra.mxu0 %v6869_v15 }
  0xab   :  { %6871 = vmatprep.subr.bf16.mxu0 %v10123_v3 }
  0xad   :  { %5597 = vmatmul.mubr.f32.gmra.mrb[4].mxu0 %v8172_v7 }
  0xae   :  { %5599 = vmatprep.mubr.msk.f32.mxu0 %vm7918_vm0, %v10121_v10  ;;  %6873 = vmatpush3.bf16.msra.mxu0 %v6872_v17  ;;  %v7046_v17 = vpack.c.bf16 %v8276_v38, %v8271_v36  ;;  %v7052_v36 = vpack.c.bf16 %v8314_v21, %v8311_v20 }
  0xaf   :  { %6874 = vmatprep.subr.bf16.mxu0 %v10123_v3 }
  0xb1   :  { %5600 = vmatmul.mubr.f32.gmra.mrb[6].mxu0 %v8195_v29 }
  0xb2   :  { %5602 = vmatprep.mubr.msk.f32.mxu0 %vm7918_vm0, %v10121_v10 }
  0xb5   :  { %5603 = vmatmul.mubr.f32.gmra.mrb[8].mxu0 %v8214_v34 }
  0xb6   :  { %5617 = vmatprep.mubr.msk.f32.mxu0 %vm7918_vm0, %v10121_v10 }
  0xb9   :  { %5618 = vmatmul.mubr.f32.vlgmr.msra.gmra.mrb[0].mxu0 %v8122_v40 }
  0xba   :  { %6876 = vmatpush3.bf16.msra.mxu0 %v8125_v45  ;;  %5620 = vmatprep.mubr.msk.f32.mxu0 %vm7918_vm0, %v10121_v10  ;;  %v1826_v45 = vsub.f32 %v8276_v38, %v1825_v46  ;;  %v1847_v46 = vsub.f32 %v8311_v20, %v1846_v22  ;;  %v7049_v22 = vpack.c.bf16 %v8295_v51, %v8292_v50  ;;  %v8443_v38 = vld [vmem:[#allocation14] sm:$0xff] }
  0xbb   :  { %6877 = vmatprep.subr.bf16.mxu0 %v10123_v3  ;;  %v10118_v51 = vand.u32 4294901760, %v8443_v38 }
  0xbc   :  { %v1827_v12 = vand.u32 4294901760, %v1826_v45  ;;  %v1848_v15 = vand.u32 4294901760, %v1847_v46  ;;  %v10112_v45 = vand.u32 4294901760, %v8460_v24 }
  0xbd   :  { %5621 = vmatmul.mubr.f32.gmra.mrb[2].mxu0 %v8132_v48 }
  0xbe   :  { %5623 = vmatprep.mubr.msk.f32.mxu0 %vm7918_vm0, %v10121_v10  ;;  %6879 = vmatpush3.bf16.msra.mxu0 %v8139_v52  ;;  %v1833_v52 = vsub.f32 %v8292_v50, %v1832_v11  ;;  %v1855_v11 = vand.u32 4294901760, %v1854_v59  ;;  %v8445_v50 = vld [vmem:[#allocation14 + $0x8] sm:$0xff]  ;;  %v8514_v59 = vmul.f32 %v8263_v30, %v8061_v6  ;;  %v10108_v30 = vand.u32 4294901760, %v8510_v55 }
  0xbf   :  { %6880 = vmatprep.subr.bf16.mxu0 %v10123_v3  ;;  %v10117_v20 = vand.u32 4294901760, %v8445_v50 }
  0xc0   :  { %v1834_v39 = vand.u32 4294901760, %v1833_v52  ;;  %v7043_v33 = vpack.c.bf16 %v1855_v11, %v1848_v15  ;;  %v8518_v15 = vld [vmem:[#allocation14 + $0x38] sm:$0xff] }
  0xc1   :  { %5624 = vmatmul.mubr.f32.gmra.mrb[4].mxu0 %v8148_v56  ;;  %v8458_v21 = vpack.c.bf16 %v10117_v20, %v10118_v51 }
  0xc2   :  { %5626 = vmatprep.mubr.msk.f32.mxu0 %vm7918_vm0, %v10121_v10  ;;  %6882 = vmatpush3.bf16.msra.mxu0 %v8157_v60  ;;  %v1820_v60 = vand.u32 4294901760, %v1819_v26  ;;  %v7040_v14 = vpack.c.bf16 %v1841_v58, %v1834_v39  ;;  %v8462_v26 = vld [vmem:[#allocation14 + $0x18] sm:$0xff]  ;;  %v8487_v39 = vld [vmem:[#allocation14 + $0x20] sm:$0xff] }
  0xc3   :  { %7027 = vmatprep.subr.bf16.mxu0 %v10123_v3  ;;  %10179 = vst [vmem:[#allocation22_spill] sm:$0xff] %v8458_v21  ;;  %6885 = vmatpush3.bf16.msra.mxu1 %v8458_v21  ;;  %v10111_v52 = vand.u32 4294901760, %v8462_v26  ;;  %v10109_v58 = vand.u32 4294901760, %v8487_v39 }
  0xc4   :  { %v7037_v42 = vpack.c.bf16 %v1827_v12, %v1820_v60  ;;  %6886 = vmatprep.subr.bf16.mxu1 %v10123_v3  ;;  %v8481_v12 = vmul.f32 %v8250_v53, %v8052_v0  ;;  %v10103_v53 = vand.u32 4294901760, %v8485_v27 }
  0xc5   :  { %5627 = vmatmul.mubr.f32.gmra.mrb[6].mxu0 %v8169_v5  ;;  %v8477_v60 = vpack.c.bf16 %v10111_v52, %v10112_v45  ;;  %v8590_v52 = vld [vmem:[#allocation14 + $0x50] sm:$0xff]  ;;  %v8592_v45 = vld [vmem:[#allocation14 + $0x58] sm:$0xff] }
  0xc6   :  { %5629 = vmatprep.mubr.msk.f32.mxu0 %vm7918_vm0, %v10121_v10  ;;  %v10104_v1 = vand.u32 4294901760, %v8481_v12  ;;  %v8534_v6 = vsub.f32 %v8485_v27, %v10103_v53  ;;  %v8553_v53 = vld [vmem:[#allocation14 + $0x40] sm:$0xff] }
  0xc7   :  { %10180 = vst [vmem:[#allocation23_spill] sm:$0xff] %v8477_v60  ;;  %6888 = vmatpush3.bf16.msra.mxu1 %v8477_v60 }
  0xc8   :  { %6889 = vmatprep.subr.bf16.mxu1 %v10123_v3  ;;  %v8529_v2 = vsub.f32 %v8481_v12, %v10104_v1  ;;  %v8555_v1 = vld [vmem:[#allocation14 + $0x48] sm:$0xff] }
  0xc9   :  { %5630 = vmatmul.mubr.f32.gmra.mrb[8].mxu0 %v8192_v28 }
  0xca   :  { %5644 = vmatprep.mubr.msk.f32.mxu0 %vm7918_vm0, %v10121_v10 }
  0xcd   :  { %5645 = vmatmul.mubr.f32.vlgmr.msra.gmra.mrb[0].mxu0 %v8122_v40 }
  0xce   :  { %5647 = vmatprep.mubr.msk.f32.mxu0 %vm7918_vm0, %v10121_v10  ;;  %7029 = vmatpush3.bf16.msra.mxu0 %v8368_v18 }
  0xcf   :  { %7030 = vmatprep.subr.bf16.mxu0 %v10123_v3 }
  0xd1   :  { %5648 = vmatmul.mubr.f32.gmra.mrb[2].mxu0 %v8132_v48 }
  0xd2   :  { %5650 = vmatprep.mubr.msk.f32.mxu0 %vm7918_vm0, %v10121_v10  ;;  %7032 = vmatpush3.bf16.msra.mxu0 %v8374_v19 }
  0xd3   :  { %7033 = vmatprep.subr.bf16.mxu0 %v10123_v3 }
  0xd5   :  { %5651 = vmatmul.mubr.f32.gmra.mrb[4].mxu0 %v8148_v56 }
  0xd6   :  { %5653 = vmatprep.mubr.msk.f32.mxu0 %vm7918_vm0, %v10121_v10  ;;  %7035 = vmatpush3.bf16.msra.mxu0 %v8381_v25 }
  0xd7   :  { %7036 = vmatprep.subr.bf16.mxu0 %v10123_v3 }
  0xd9   :  { %5654 = vmatmul.mubr.f32.gmra.mrb[6].mxu0 %v8169_v5 }
  0xda   :  { %5656 = vmatprep.mubr.msk.f32.mxu0 %vm7918_vm0, %v10121_v10 }
  0xdd   :  { %5657 = vmatmul.mubr.f32.gmra.mrb[8].mxu0 %v8192_v28 }
  0xde   :  { %5953 = vmatprep.mubr.msk.f32.mxu0 %vm7918_vm0, %v10121_v10 }
  0xe1   :  { %5954 = vmatmul.mubr.f32.vlgmr.msra.gmra.mrb[10].mxu0 %v8163_v63 }
  0xe2   :  { %5956 = vmatprep.mubr.msk.f32.mxu0 %vm7918_vm0, %v10121_v10  ;;  %7038 = vmatpush3.bf16.msra.mxu0 %v7037_v42  ;;  %v8489_v42 = vld [vmem:[#allocation14 + $0x28] sm:$0xff] }
  0xe3   :  { %7039 = vmatprep.subr.bf16.mxu0 %v10123_v3  ;;  %v10107_v46 = vand.u32 4294901760, %v8489_v42 }
  0xe5   :  { %5957 = vmatmul.mubr.f32.gmra.mrb[12].mxu0 %v8185_v23  ;;  %v8504_v0 = vpack.c.bf16 %v10107_v46, %v10109_v58 }
  0xe6   :  { %5959 = vmatprep.mubr.msk.f32.mxu0 %vm7918_vm0, %v10121_v10  ;;  %7041 = vmatpush3.bf16.msra.mxu0 %v7040_v14  ;;  %v8516_v14 = vld [vmem:[#allocation14 + $0x30] sm:$0xff] }
  0xe7   :  { %7042 = vmatprep.subr.bf16.mxu0 %v10123_v3  ;;  %10181 = vst [vmem:[#allocation24_spill] sm:$0xff] %v8504_v0  ;;  %6891 = vmatpush3.bf16.msra.mxu1 %v8504_v0  ;;  %v10106_v11 = vand.u32 4294901760, %v8516_v14 }
  0xe8   :  { %6892 = vmatprep.subr.bf16.mxu1 %v10123_v3 }
  0xe9   :  { %5960 = vmatmul.mubr.f32.gmra.mrb[14].mxu0 %v8206_v32 }
  0xea   :  { %5962 = vmatprep.mubr.msk.f32.mxu0 %vm7918_vm0, %v10121_v10  ;;  %7044 = vmatpush3.bf16.msra.mxu0 %v7043_v33  ;;  %v10105_v33 = vand.u32 4294901760, %v8518_v15 }
  0xeb   :  { %7045 = vmatprep.subr.bf16.mxu0 %v10123_v3 }
  0xec   :  { %v8541_v4 = vpack.c.bf16 %v10105_v33, %v10106_v11  ;;  %v10114_v33 = vand.u32 4294901760, %v8553_v53  ;;  %v10113_v11 = vand.u32 4294901760, %v8555_v1 }
  0xed   :  { %5963 = vmatmul.mubr.f32.gmra.mrb[16].mxu0 %v8220_v35 }
  0xee   :  { %5965 = vmatprep.mubr.msk.f32.mxu0 %vm7918_vm0, %v10121_v10  ;;  %10182 = vst [vmem:[#allocation25_spill] sm:$0xff] %v8541_v4  ;;  %6894 = vmatpush3.bf16.msra.mxu1 %v8541_v4  ;;  %v8580_v46 = vpack.c.bf16 %v10113_v11, %v10114_v33  ;;  %v10130_v11 = vand.u32 4294901760, %v8590_v52  ;;  %v10127_v33 = vand.u32 4294901760, %v8592_v45  ;;  %v10189_v4 = vand.u32 4294901760, %v8443_v38 }
  0xef   :  { %6895 = vmatprep.subr.bf16.mxu1 %v10123_v3 }
  0xf0   :  { %10183 = vst [vmem:[#allocation26_spill] sm:$0xff] %v8580_v46  ;;  %v8651_v0 = vsub.f32 %v8443_v38, %v10189_v4 }
  0xf1   :  { %5966 = vmatmul.mubr.f32.gmra.mrb[18].mxu0 %v8230_v37 }
  0xf2   :  { %5980 = vmatprep.mubr.msk.f32.mxu0 %vm7918_vm0, %v10121_v10  ;;  %6897 = vmatpush3.bf16.msra.mxu1 %v8580_v46  ;;  %10190 = vst [vmem:[#allocation30_spill] sm:$0xff] %v8651_v0 }
  0xf3   :  { %6898 = vmatprep.subr.bf16.mxu1 %v10123_v3 }
  0xf5   :  { %5981 = vmatmul.mubr.f32.vlgmr.msra.gmra.mrb[10].mxu0 %v8122_v40 }
  0xf6   :  { %5983 = vmatprep.mubr.msk.f32.mxu0 %vm7918_vm0, %v10121_v10  ;;  %7047 = vmatpush3.bf16.msra.mxu0 %v7046_v17  ;;  %v10110_v17 = vand.u32 4294901760, %v8514_v59 }
  0xf7   :  { %7048 = vmatprep.subr.bf16.mxu0 %v10123_v3 }
  0xf9   :  { %5984 = vmatmul.mubr.f32.gmra.mrb[12].mxu0 %v8132_v48 }
  0xfa   :  { %5986 = vmatprep.mubr.msk.f32.mxu0 %vm7918_vm0, %v10121_v10  ;;  %7050 = vmatpush3.bf16.msra.mxu0 %v7049_v22  ;;  %v8547_v22 = vmul.f32 %v8280_v41, %v8064_v8  ;;  %v8566_v8 = vsub.f32 %v8510_v55, %v10108_v30  ;;  %v10116_v41 = vand.u32 4294901760, %v8529_v2 }
  0xfb   :  { %7051 = vmatprep.subr.bf16.mxu0 %v10123_v3 }
  0xfc   :  { %v10120_v30 = vand.u32 4294901760, %v8547_v22  ;;  %v10129_v20 = vand.u32 4294901760, %v8566_v8 }
  0xfd   :  { %5987 = vmatmul.mubr.f32.gmra.mrb[14].mxu0 %v8148_v56 }
  0xfe   :  { %5989 = vmatprep.mubr.msk.f32.mxu0 %vm7918_vm0, %v10121_v10  ;;  %7053 = vmatpush3.bf16.msra.mxu0 %v7052_v36  ;;  %v8551_v36 = vmul.f32 %v8282_v43, %v8069_v9  ;;  %v8571_v9 = vsub.f32 %v8514_v59, %v10110_v17  ;;  %v10115_v43 = vand.u32 4294901760, %v8534_v6 }
  0xff   :  { %7054 = vmatprep.subr.bf16.mxu0 %v10123_v3 }
 0x100   :  { %v10119_v58 = vand.u32 4294901760, %v8551_v36  ;;  %v8588_v17 = vpack.c.bf16 %v10115_v43, %v10116_v41  ;;  %v8604_v43 = vsub.f32 %v8547_v22, %v10120_v30  ;;  %v10128_v51 = vand.u32 4294901760, %v8571_v9  ;;  %v8627_v30 = vld [vmem:[#allocation14 + $0x60] sm:$0xff] }
 0x101   :  { %5990 = vmatmul.mubr.f32.gmra.mrb[16].mxu0 %v8169_v5 }
 0x102   :  { %5992 = vmatprep.mubr.msk.f32.mxu0 %vm7918_vm0, %v10121_v10  ;;  %v8609_v41 = vsub.f32 %v8551_v36, %v10119_v58  ;;  %v8625_v58 = vpack.c.bf16 %v10128_v51, %v10129_v20  ;;  %v10193_v20 = vand.u32 4294901760, %v8604_v43 }
 0x104   :  { %10185 = vst [vmem:[#allocation28_spill] sm:$0xff] %v8625_v58  ;;  %v10194_v60 = vand.u32 4294901760, %v8609_v41  ;;  %v8664_v58 = vld [vmem:[#allocation14 + $0x70] sm:$0xff] }
 0x105   :  { %5993 = vmatmul.mubr.f32.gmra.mrb[18].mxu0 %v8192_v28  ;;  %v10149_v38 = vand.u32 4294901760, %v8664_v58 }
 0x106   :  { %6007 = vmatprep.mubr.msk.f32.mxu0 %vm7918_vm0, %v10121_v10  ;;  %v8662_v21 = vpack.c.bf16 %v10194_v60, %v10193_v20 }
 0x108   :  { %10195 = vst [vmem:[#allocation32_spill] sm:$0xff] %v8662_v21  ;;  %v10199_v21 = vand.u32 4294901760, %v8462_v26 }
 0x109   :  { %6008 = vmatmul.mubr.f32.vlgmr.msra.gmra.mrb[10].mxu0 %v8129_v47 }
 0x10a   :  { %6010 = vmatprep.mubr.msk.f32.mxu0 %vm7918_vm0, %v10121_v10  ;;  %7056 = vmatpush3.bf16.msra.mxu0 %v8368_v18 }
 0x10b   :  { %7057 = vmatprep.subr.bf16.mxu0 %v10123_v3 }
 0x10d   :  { %6011 = vmatmul.mubr.f32.gmra.mrb[12].mxu0 %v8143_v54 }
 0x10e   :  { %6013 = vmatprep.mubr.msk.f32.mxu0 %vm7918_vm0, %v10121_v10  ;;  %7059 = vmatpush3.bf16.msra.mxu0 %v8374_v19 }
 0x10f   :  { %7060 = vmatprep.subr.bf16.mxu0 %v10123_v3 }
 0x111   :  { %6014 = vmatmul.mubr.f32.gmra.mrb[14].mxu0 %v8161_v62 }
 0x112   :  { %6016 = vmatprep.mubr.msk.f32.mxu0 %vm7918_vm0, %v10121_v10  ;;  %7062 = vmatpush3.bf16.msra.mxu0 %v8381_v25 }
 0x113   :  { %7063 = vmatprep.subr.bf16.mxu0 %v10123_v3 }
 0x115   :  { %6017 = vmatmul.mubr.f32.gmra.mrb[16].mxu0 %v8182_v13 }
 0x116   :  { %6019 = vmatprep.mubr.msk.f32.mxu0 %vm7918_vm0, %v10121_v10 }
 0x119   :  { %6020 = vmatmul.mubr.f32.gmra.mrb[18].mxu0 %v8203_v31 }
 0x11a   :  { %6034 = vmatprep.mubr.msk.f32.mxu0 %vm7918_vm0, %v10121_v10 }
 0x11d   :  { %6035 = vmatmul.mubr.f32.vlgmr.msra.gmra.mrb[10].mxu0 %v8135_v49 }
 0x11e   :  { %6037 = vmatprep.mubr.msk.f32.mxu0 %vm7918_vm0, %v10121_v10  ;;  %7065 = vmatpush3.bf16.msra.mxu0 %v8301_v61  ;;  %v8619_v61 = vpack.c.bf16 %v10127_v33, %v10130_v11  ;;  %v8629_v10 = vld [vmem:[#allocation14 + $0x68] sm:$0xff]  ;;  %v10186_v33 = vmov 0.0   ;;  %v10187_v11 = vmov 0.0|0.0  }
 0x11f   :  { %7066 = vmatprep.subr.bf16.mxu0 %v10123_v3  ;;  %v10142_v3 = vand.u32 4294901760, %v8627_v30  ;;  %v10141_v46 = vand.u32 4294901760, %v8629_v10 }
 0x120   :  { %10184 = vst [vmem:[#allocation27_spill] sm:$0xff] %v8619_v61  ;;  %6900 = vmatpush3.bf16.msra.mxu1 %v8619_v61 }
 0x121   :  { %6038 = vmatmul.mubr.f32.gmra.mrb[12].mxu0 %v8151_v57  ;;  %6901 = vmatprep.subr.bf16.mxu1 %v10187_v11  ;;  %v8646_v61 = vpack.c.bf16 %v10141_v46, %v10142_v3  ;;  %v8666_v46 = vld [vmem:[#allocation14 + $0x78] sm:$0xff] }
 0x122   :  { %6040 = vmatprep.mubr.msk.f32.mxu0 %vm7918_vm0, %v10186_v33  ;;  %7068 = vmatpush3.bf16.msra.mxu0 %v8319_v16  ;;  %v10191_v16 = vand.u32 4294901760, %v8445_v50  ;;  %v10146_v4 = vand.u32 4294901760, %v8666_v46 }
 0x123   :  { %7069 = vmatprep.subr.bf16.mxu0 %v10187_v11  ;;  %10188 = vst [vmem:[#allocation29_spill] sm:$0xff] %v8646_v61 }
 0x124   :  { %v8656_v51 = vsub.f32 %v8445_v50, %v10191_v16  ;;  %6903 = vmatpush3.bf16.msra.mxu1 %v8646_v61  ;;  %v10147_v50 = vand.u32 4294901760, %v8651_v0  ;;  %v8683_v20 = vpack.c.bf16 %v10146_v4, %v10149_v38  ;;  %v10204_v38 = vand.u32 4294901760, %v8489_v42 }
 0x125   :  { %6041 = vmatmul.mubr.f32.gmra.mrb[14].mxu0 %v8172_v7  ;;  %6904 = vmatprep.subr.bf16.mxu1 %v10187_v11  ;;  %v8699_v7 = vsub.f32 %v8462_v26, %v10199_v21 }
 0x126   :  { %10192 = vst [vmem:[#allocation31_spill] sm:$0xff] %v8656_v51  ;;  %v10148_v16 = vand.u32 4294901760, %v8656_v51  ;;  %6043 = vmatprep.mubr.msk.f32.mxu0 %vm7918_vm0, %v10186_v33  ;;  %7071 = vmatpush3.bf16.msra.mxu0 %v8331_v44  ;;  %10196 = vst [vmem:[#allocation33_spill] sm:$0xff] %v8683_v20  ;;  %v1011_v60 = vsub.f32 %v8651_v0, %v10147_v50  ;;  %v10197_v44 = vand.u32 4294901760, %v8460_v24 }
 0x127   :  { %7072 = vmatprep.subr.bf16.mxu0 %v10187_v11  ;;  %10200 = vst [vmem:[#allocation35_spill] sm:$0xff] %v8699_v7 }
 0x128   :  { %v1018_v3 = vsub.f32 %v8656_v51, %v10148_v16  ;;  %v8694_v61 = vsub.f32 %v8460_v24, %v10197_v44  ;;  %6906 = vmatpush3.bf16.msra.mxu1 %v8683_v20  ;;  %v1012_v4 = vand.u32 4294901760, %v1011_v60  ;;  %v10153_v24 = vand.u32 4294901760, %v8699_v7 }
 0x129   :  { %6044 = vmatmul.mubr.f32.gmra.mrb[16].mxu0 %v8195_v29  ;;  %6907 = vmatprep.subr.bf16.mxu1 %v10187_v11  ;;  %v8724_v20 = vsub.f32 %v8489_v42, %v10204_v38  ;;  %v10206_v38 = vand.u32 4294901760, %v8516_v14 }
 0x12a   :  { %10198 = vst [vmem:[#allocation34_spill] sm:$0xff] %v8694_v61  ;;  %v1019_v50 = vand.u32 4294901760, %v1018_v3  ;;  %6046 = vmatprep.mubr.msk.f32.mxu0 %vm7918_vm0, %v10186_v33  ;;  %v10152_v16 = vand.u32 4294901760, %v8694_v61  ;;  %v1032_v26 = vsub.f32 %v8699_v7, %v10153_v24  ;;  %v10202_v3 = vand.u32 4294901760, %v8487_v39 }
 0x12b   :  { %10205 = vst [vmem:[#allocation38_spill] sm:$0xff] %v8724_v20  ;;  %v10155_v24 = vand.u32 4294901760, %v8724_v20 }
 0x12c   :  { %v8708_v44 = vpack.c.bf16 %v1019_v50, %v1012_v4  ;;  %v1025_v21 = vsub.f32 %v8694_v61, %v10152_v16  ;;  %v8719_v60 = vsub.f32 %v8487_v39, %v10202_v3  ;;  %v1033_v50 = vand.u32 4294901760, %v1032_v26 }
 0x12d   :  { %6047 = vmatmul.mubr.f32.gmra.mrb[18].mxu0 %v8214_v34  ;;  %v1046_v42 = vsub.f32 %v8724_v20, %v10155_v24  ;;  %v8742_v3 = vsub.f32 %v8516_v14, %v10206_v38 }
 0x12e   :  { %10201 = vst [vmem:[#allocation36_spill] sm:$0xff] %v8708_v44  ;;  %10203 = vst [vmem:[#allocation37_spill] sm:$0xff] %v8719_v60  ;;  %6061 = vmatprep.mubr.msk.f32.mxu0 %vm7918_vm0, %v10186_v33  ;;  %v1026_v4 = vand.u32 4294901760, %v1025_v21  ;;  %v10156_v16 = vand.u32 4294901760, %v8719_v60  ;;  %v10207_v21 = vand.u32 4294901760, %v8518_v15 }
 0x12f   :  { %v10158_v24 = vand.u32 4294901760, %v8742_v3 }
 0x130   :  { %v8731_v44 = vpack.c.bf16 %v1033_v50, %v1026_v4  ;;  %v1039_v39 = vsub.f32 %v8719_v60, %v10156_v16  ;;  %v8748_v26 = vsub.f32 %v8518_v15, %v10207_v21  ;;  %v1047_v50 = vand.u32 4294901760, %v1046_v42 }
 0x131   :  { %6062 = vmatmul.mubr.f32.vlgmr.msra.gmra.mrb[10].mxu0 %v8122_v40  ;;  %v1053_v15 = vsub.f32 %v8742_v3, %v10158_v24  ;;  %v10209_v21 = vand.u32 4294901760, %v8553_v53 }
 0x132   :  { %6064 = vmatprep.mubr.msk.f32.mxu0 %vm7918_vm0, %v10186_v33  ;;  %7074 = vmatpush3.bf16.msra.mxu0 %v8368_v18  ;;  %v1040_v4 = vand.u32 4294901760, %v1039_v39  ;;  %v10157_v14 = vand.u32 4294901760, %v8748_v26  ;;  %v10210_v18 = vand.u32 4294901760, %v8555_v1 }
 0x133   :  { %7075 = vmatprep.subr.bf16.mxu0 %v10187_v11  ;;  %v8764_v16 = vsub.f32 %v8553_v53, %v10209_v21 }
 0x134   :  { %v8756_v38 = vpack.c.bf16 %v1047_v50, %v1040_v4  ;;  %v8769_v39 = vsub.f32 %v8555_v1, %v10210_v18  ;;  %v1060_v42 = vsub.f32 %v8748_v26, %v10157_v14  ;;  %v1054_v4 = vand.u32 4294901760, %v1053_v15 }
 0x135   :  { %6065 = vmatmul.mubr.f32.gmra.mrb[12].mxu0 %v8132_v48  ;;  %v10160_v53 = vand.u32 4294901760, %v8764_v16  ;;  %v10211_v14 = vand.u32 4294901760, %v8590_v52  ;;  %v10212_v15 = vand.u32 4294901760, %v8592_v45 }
 0x136   :  { %10208 = vst [vmem:[#allocation39_spill] sm:$0xff] %v8756_v38  ;;  %6067 = vmatprep.mubr.msk.f32.mxu0 %vm7918_vm0, %v10186_v33  ;;  %7077 = vmatpush3.bf16.msra.mxu0 %v8374_v19  ;;  %v10159_v50 = vand.u32 4294901760, %v8769_v39  ;;  %v1061_v1 = vand.u32 4294901760, %v1060_v42 }
 0x137   :  { %7078 = vmatprep.subr.bf16.mxu0 %v10187_v11  ;;  %v1067_v21 = vsub.f32 %v8764_v16, %v10160_v53  ;;  %v8790_v19 = vsub.f32 %v8590_v52, %v10211_v14  ;;  %v8795_v24 = vsub.f32 %v8592_v45, %v10212_v15 }
 0x138   :  { %v1074_v18 = vsub.f32 %v8769_v39, %v10159_v50  ;;  %v8798_v42 = vpack.c.bf16 %v1061_v1, %v1054_v4 }
 0x139   :  { %6068 = vmatmul.mubr.f32.gmra.mrb[14].mxu0 %v8148_v56  ;;  %v1068_v50 = vand.u32 4294901760, %v1067_v21  ;;  %v10163_v38 = vand.u32 4294901760, %v8790_v19  ;;  %v10162_v52 = vand.u32 4294901760, %v8795_v24  ;;  %v10214_v21 = vand.u32 4294901760, %v8629_v10 }
 0x13a   :  { %6070 = vmatprep.mubr.msk.f32.mxu0 %vm7918_vm0, %v10186_v33  ;;  %7080 = vmatpush3.bf16.msra.mxu0 %v8381_v25  ;;  %v1075_v53 = vand.u32 4294901760, %v1074_v18  ;;  %v10213_v25 = vand.u32 4294901760, %v8627_v30 }
 0x13b   :  { %7225 = vmatprep.subr.bf16.mxu0 %v10187_v11  ;;  %v1081_v45 = vsub.f32 %v8790_v19, %v10163_v38  ;;  %v1088_v4 = vsub.f32 %v8795_v24, %v10162_v52 }
 0x13c   :  { %v8806_v14 = vpack.c.bf16 %v1075_v53, %v1068_v50  ;;  %v8817_v1 = vsub.f32 %v8627_v30, %v10213_v25  ;;  %v8823_v53 = vsub.f32 %v8629_v10, %v10214_v21  ;;  %v10216_v25 = vand.u32 4294901760, %v8664_v58 }
 0x13d   :  { %6071 = vmatmul.mubr.f32.gmra.mrb[16].mxu0 %v8169_v5  ;;  %v1082_v50 = vand.u32 4294901760, %v1081_v45  ;;  %v1089_v18 = vand.u32 4294901760, %v1088_v4  ;;  %v10217_v21 = vand.u32 4294901760, %v8666_v46 }
 0x13e   :  { %6073 = vmatprep.mubr.msk.f32.mxu0 %vm7918_vm0, %v10186_v33  ;;  %v10164_v15 = vand.u32 4294901760, %v8817_v1  ;;  %v10166_v52 = vand.u32 4294901760, %v8823_v53  ;;  %v8837_v10 = vsub.f32 %v8664_v58, %v10216_v25 }
 0x13f   :  { %v8829_v38 = vpack.c.bf16 %v1089_v18, %v1082_v50  ;;  %v8842_v45 = vsub.f32 %v8666_v46, %v10217_v21  ;;  %v10218_v50 = vand.u32 4294901760, %v8481_v12  ;;  %v10219_v18 = vand.u32 4294901760, %v8485_v27 }
 0x140   :  { %v1095_v30 = vsub.f32 %v8817_v1, %v10164_v15  ;;  %v1102_v4 = vsub.f32 %v8823_v53, %v10166_v52  ;;  %v10168_v15 = vand.u32 4294901760, %v8837_v10  ;;  %v10220_v27 = vand.u32 4294901760, %v8510_v55 }
 0x141   :  { %10215 = vst [vmem:[#allocation40_spill] sm:$0xff] %v8829_v38  ;;  %6074 = vmatmul.mubr.f32.gmra.mrb[18].mxu0 %v8192_v28  ;;  %v8854_v58 = vpack.c.bf16 %v10219_v18, %v10218_v50  ;;  %v10167_v46 = vand.u32 4294901760, %v8842_v45  ;;  %v10223_v55 = vand.u32 4294901760, %v8551_v36  ;;  %v8907_v36 = vpack.c.bf16 %v8699_v7, %v8694_v61 }
 0x142   :  { %6088 = vmatprep.mubr.msk.f32.mxu0 %vm7918_vm0, %v10186_v33  ;;  %v1096_v25 = vand.u32 4294901760, %v1095_v30  ;;  %v1103_v21 = vand.u32 4294901760, %v1102_v4  ;;  %v1109_v38 = vsub.f32 %v8837_v10, %v10168_v15  ;;  %v10221_v30 = vand.u32 4294901760, %v8514_v59 }
 0x143   :  { %v1116_v52 = vsub.f32 %v8842_v45, %v10167_v46  ;;  %v8922_v7 = vpack.c.bf16 %v8724_v20, %v8719_v60  ;;  %v8937_v60 = vpack.c.bf16 %v8748_v26, %v8742_v3 }
 0x144   :  { %v8865_v12 = vpack.c.bf16 %v1103_v21, %v1096_v25  ;;  %v8874_v4 = vpack.c.bf16 %v10221_v30, %v10220_v27  ;;  %v1110_v50 = vand.u32 4294901760, %v1109_v38  ;;  %v10222_v25 = vand.u32 4294901760, %v8547_v22 }
 0x145   :  { %6089 = vmatmul.mubr.f32.vlgmr.msra.gmra.mrb[10].mxu0 %v8122_v40  ;;  %v1117_v18 = vand.u32 4294901760, %v1116_v52  ;;  %v8892_v38 = vpack.c.bf16 %v8656_v51, %v8651_v0  ;;  %v10224_v52 = vand.u32 4294901760, %v8529_v2  ;;  %v10225_v27 = vand.u32 4294901760, %v8534_v6 }
 0x146   :  { %6091 = vmatprep.mubr.msk.f32.mxu0 %vm7918_vm0, %v10186_v33  ;;  %7227 = vmatpush3.bf16.msra.mxu0 %v8854_v58  ;;  %v8887_v59 = vpack.c.bf16 %v10223_v55, %v10222_v25  ;;  %v10227_v55 = vand.u32 4294901760, %v8571_v9 }
 0x147   :  { %7228 = vmatprep.subr.bf16.mxu0 %v10187_v11  ;;  %v8877_v46 = vpack.c.bf16 %v1117_v18, %v1110_v50  ;;  %v3326_v21 = vsub.f32 %v8529_v2, %v10224_v52  ;;  %v3333_v22 = vsub.f32 %v8534_v6, %v10225_v27  ;;  %v10226_v18 = vand.u32 4294901760, %v8566_v8 }
 0x148   :  { %v3347_v52 = vsub.f32 %v8571_v9, %v10227_v55  ;;  %v10229_v55 = vand.u32 4294901760, %v8609_v41 }
 0x149   :  { %6092 = vmatmul.mubr.f32.gmra.mrb[12].mxu0 %v8132_v48  ;;  %v3327_v30 = vand.u32 4294901760, %v3326_v21  ;;  %v3334_v50 = vand.u32 4294901760, %v3333_v22  ;;  %v3340_v25 = vsub.f32 %v8566_v8, %v10226_v18  ;;  %v10228_v18 = vand.u32 4294901760, %v8604_v43 }
 0x14a   :  { %6094 = vmatprep.mubr.msk.f32.mxu0 %vm7918_vm0, %v10186_v33  ;;  %7230 = vmatpush3.bf16.msra.mxu0 %v8874_v4  ;;  %v3348_v61 = vand.u32 4294901760, %v3347_v52 }
 0x14b   :  { %7231 = vmatprep.subr.bf16.mxu0 %v10187_v11  ;;  %v7235_v21 = vpack.c.bf16 %v3334_v50, %v3327_v30  ;;  %v3341_v22 = vand.u32 4294901760, %v3340_v25  ;;  %v3354_v51 = vsub.f32 %v8604_v43, %v10228_v18 }
 0x14c   :  { %v8918_v27 = vpop.f32.mrb[0].mxu1 }
 0x14d   :  { %6095 = vmatmul.mubr.f32.gmra.mrb[14].mxu0 %v8148_v56  ;;  %v5511_v15 = vpop.f32.mrb[1].mxu1  ;;  %v7238_v30 = vpack.c.bf16 %v3348_v61, %v3341_v22  ;;  %v3355_v50 = vand.u32 4294901760, %v3354_v51  ;;  %v8957_v61 = vpack.c.bf16 %v8795_v24, %v8790_v19 }
 0x14e   :  { %6097 = vmatprep.mubr.msk.f32.mxu0 %vm7918_vm0, %v10186_v33  ;;  %7233 = vmatpush3.bf16.msra.mxu0 %v8887_v59  ;;  %v3361_v15 = vsub.f32 %v8609_v41, %v10229_v55  ;;  %v8967_v55 = vpack.c.bf16 %v8823_v53, %v8817_v1 }
 0x14f   :  { %7234 = vmatprep.subr.bf16.mxu0 %v10187_v11 }
 0x150   :  { %v8933_v0 = vpop.f32.mrb[2].mxu1  ;;  %v3362_v25 = vand.u32 4294901760, %v3361_v15  ;;  %v7244_v15 = vpack.c.bf16 %v8534_v6, %v8529_v2 }
 0x151   :  { %6098 = vmatmul.mubr.f32.gmra.mrb[16].mxu0 %v8169_v5  ;;  %v5514_v20 = vpop.f32.mrb[3].mxu1 }
 0x152   :  { %6100 = vmatprep.mubr.msk.f32.mxu0 %vm7918_vm0, %v10186_v33  ;;  %v8947_v20 = vpack.c.bf16 %v8769_v39, %v8764_v16 }
 0x154   :  { %v8942_v52 = vpop.f32.mrb[4].mxu1 }
 0x155   :  { %6101 = vmatmul.mubr.f32.gmra.mrb[18].mxu0 %v8192_v28  ;;  %v5517_v18 = vpop.f32.mrb[5].mxu1 }
 0x156   :  { %6397 = vmatprep.mubr.msk.f32.mxu0 %vm7918_vm0, %v10186_v33 }
 0x159   :  { %6398 = vmatmul.mubr.f32.vlgmr.msra.gmra.mrb[20].mxu0 %v8163_v63  ;;  %v7241_v63 = vpack.c.bf16 %v3362_v25, %v3355_v50 }
 0x15a   :  { %6400 = vmatprep.mubr.msk.f32.mxu0 %vm7918_vm0, %v10186_v33  ;;  %7236 = vmatpush3.bf16.msra.mxu0 %v7235_v21  ;;  %v8952_v21 = vpop.f32.mrb[6].mxu1 }
 0x15b   :  { %7237 = vmatprep.subr.bf16.mxu0 %v10187_v11  ;;  %v5520_v51 = vpop.f32.mrb[7].mxu1 }
 0x15d   :  { %6401 = vmatmul.mubr.f32.gmra.mrb[22].mxu0 %v8185_v23  ;;  %v8962_v23 = vpop.f32.mrb[8].mxu1 }
 0x15e   :  { %6403 = vmatprep.mubr.msk.f32.mxu0 %vm7918_vm0, %v10186_v33  ;;  %7239 = vmatpush3.bf16.msra.mxu0 %v7238_v30  ;;  %v5523_v22 = vpop.f32.mrb[9].mxu1 }
 0x15f   :  { %7240 = vmatprep.subr.bf16.mxu0 %v10187_v11  ;;  %v10233_v22 = vld [vmem:[#allocation36_spill] sm:$0xff] }
 0x161   :  { %6404 = vmatmul.mubr.f32.gmra.mrb[24].mxu0 %v8206_v32  ;;  %v8974_v32 = vpack.c.bf16 %v8842_v45, %v8837_v10 }
 0x162   :  { %6406 = vmatprep.mubr.msk.f32.mxu0 %vm7918_vm0, %v10186_v33  ;;  %7242 = vmatpush3.bf16.msra.mxu0 %v7241_v63 }
 0x163   :  { %7243 = vmatprep.subr.bf16.mxu0 %v10187_v11 }
 0x165   :  { %6407 = vmatmul.mubr.f32.gmra.mrb[26].mxu0 %v8220_v35  ;;  %v7247_v35 = vpack.c.bf16 %v8571_v9, %v8566_v8 }
 0x166   :  { %6409 = vmatprep.mubr.msk.f32.mxu0 %vm7918_vm0, %v10186_v33 }
 0x169   :  { %6410 = vmatmul.mubr.f32.gmra.mrb[28].mxu0 %v8230_v37  ;;  %v7250_v37 = vpack.c.bf16 %v8609_v41, %v8604_v43 }
 0x16a   :  { %6424 = vmatprep.mubr.msk.f32.mxu0 %vm7918_vm0, %v10186_v33 }
 0x16d   :  { %6425 = vmatmul.mubr.f32.vlgmr.msra.gmra.mrb[20].mxu0 %v8122_v40 }
 0x16e   :  { %6427 = vmatprep.mubr.msk.f32.mxu0 %vm7918_vm0, %v10186_v33  ;;  %7245 = vmatpush3.bf16.msra.mxu0 %v7244_v15 }
 0x16f   :  { %7246 = vmatprep.subr.bf16.mxu0 %v10187_v11 }
 0x171   :  { %6428 = vmatmul.mubr.f32.gmra.mrb[22].mxu0 %v8132_v48 }
 0x172   :  { %6430 = vmatprep.mubr.msk.f32.mxu0 %vm7918_vm0, %v10186_v33  ;;  %7248 = vmatpush3.bf16.msra.mxu0 %v7247_v35 }
 0x173   :  { %7249 = vmatprep.subr.bf16.mxu0 %v10187_v11 }
 0x175   :  { %6431 = vmatmul.mubr.f32.gmra.mrb[24].mxu0 %v8148_v56 }
 0x176   :  { %6433 = vmatprep.mubr.msk.f32.mxu0 %vm7918_vm0, %v10186_v33  ;;  %7251 = vmatpush3.bf16.msra.mxu0 %v7250_v37 }
 0x177   :  { %7252 = vmatprep.subr.bf16.mxu0 %v10187_v11 }
 0x179   :  { %6434 = vmatmul.mubr.f32.gmra.mrb[26].mxu0 %v8169_v5 }
 0x17a   :  { %6436 = vmatprep.mubr.msk.f32.mxu0 %vm7918_vm0, %v10186_v33 }
 0x17d   :  { %6437 = vmatmul.mubr.f32.gmra.mrb[28].mxu0 %v8192_v28 }
 0x17e   :  { %6451 = vmatprep.mubr.msk.f32.mxu0 %vm7918_vm0, %v10186_v33 }
 0x181   :  { %6452 = vmatmul.mubr.f32.vlgmr.msra.gmra.mrb[20].mxu0 %v8129_v47  ;;  %v10230_v47 = vld [vmem:[#allocation28_spill] sm:$0xff] }
 0x182   :  { %6454 = vmatprep.mubr.msk.f32.mxu0 %vm7918_vm0, %v10186_v33  ;;  %7254 = vmatpush3.bf16.msra.mxu0 %v8854_v58 }
 0x183   :  { %7255 = vmatprep.subr.bf16.mxu0 %v10187_v11 }
 0x185   :  { %6455 = vmatmul.mubr.f32.gmra.mrb[22].mxu0 %v8143_v54  ;;  %v10231_v54 = vld [vmem:[#allocation21_spill] sm:$0xff] }
 0x186   :  { %6457 = vmatprep.mubr.msk.f32.mxu0 %vm7918_vm0, %v10186_v33  ;;  %7257 = vmatpush3.bf16.msra.mxu0 %v8874_v4 }
 0x187   :  { %7258 = vmatprep.subr.bf16.mxu0 %v10187_v11 }
 0x189   :  { %6458 = vmatmul.mubr.f32.gmra.mrb[24].mxu0 %v8161_v62 }
 0x18a   :  { %6460 = vmatprep.mubr.msk.f32.mxu0 %vm7918_vm0, %v10186_v33  ;;  %7260 = vmatpush3.bf16.msra.mxu0 %v8887_v59 }
 0x18b   :  { %7261 = vmatprep.subr.bf16.mxu0 %v10187_v11 }
 0x18d   :  { %6461 = vmatmul.mubr.f32.gmra.mrb[26].mxu0 %v8182_v13 }
 0x18e   :  { %6463 = vmatprep.mubr.msk.f32.mxu0 %vm7918_vm0, %v10186_v33 }
 0x191   :  { %6464 = vmatmul.mubr.f32.gmra.mrb[28].mxu0 %v8203_v31 }
 0x192   :  { %6478 = vmatprep.mubr.msk.f32.mxu0 %vm7918_vm0, %v10186_v33 }
 0x195   :  { %6479 = vmatmul.mubr.f32.vlgmr.msra.gmra.mrb[20].mxu0 %v8135_v49  ;;  %v10232_v49 = vld [vmem:[#allocation32_spill] sm:$0xff] }
 0x196   :  { %6481 = vmatprep.mubr.msk.f32.mxu0 %vm7918_vm0, %v10186_v33  ;;  %7263 = vmatpush3.bf16.msra.mxu0 %v8588_v17 }
 0x197   :  { %7264 = vmatprep.subr.bf16.mxu0 %v10187_v11 }
 0x199   :  { %6482 = vmatmul.mubr.f32.gmra.mrb[22].mxu0 %v8151_v57 }
 0x19a   :  { %6484 = vmatprep.mubr.msk.f32.mxu0 %vm7918_vm0, %v10186_v33  ;;  %7266 = vmatpush3.bf16.msra.mxu0 %v10230_v47 }
 0x19b   :  { %7267 = vmatprep.subr.bf16.mxu0 %v10187_v11 }
 0x19d   :  { %6485 = vmatmul.mubr.f32.gmra.mrb[24].mxu0 %v10231_v54 }
 0x19e   :  { %6487 = vmatprep.mubr.msk.f32.mxu0 %vm7918_vm0, %v10186_v33  ;;  %7269 = vmatpush3.bf16.msra.mxu0 %v10232_v49 }
 0x19f   :  { %7270 = vmatprep.subr.bf16.mxu0 %v10187_v11 }
 0x1a0   :  { %v848_v62 = vpop.f32.mrb[0].mxu0 }
 0x1a1   :  { %v7423_v13 = vadd.f32 %v848_v62, %v8918_v27  ;;  %v5646_v57 = vpop.f32.mrb[1].mxu0  ;;  %6488 = vmatmul.mubr.f32.gmra.mrb[26].mxu0 %v8195_v29 }
 0x1a2   :  { %6490 = vmatprep.mubr.msk.f32.mxu0 %vm7918_vm0, %v10186_v33 }
 0x1a3   :  { %v9043_v31 = vand.u32 4294901760, %v7423_v13 }
 0x1a4   :  { %v854_v2 = vpop.f32.mrb[2].mxu0 }
 0x1a5   :  { %v9046_v6 = vsub.f32 %v7423_v13, %v9043_v31  ;;  %v7424_v17 = vadd.f32 %v854_v2, %v8933_v0  ;;  %v5649_v8 = vpop.f32.mrb[3].mxu0  ;;  %6491 = vmatmul.mubr.f32.gmra.mrb[28].mxu0 %v8214_v34 }
 0x1a6   :  { %6505 = vmatprep.mubr.msk.f32.mxu0 %vm7918_vm0, %v10186_v33 }
 0x1a7   :  { %v959_v9 = vand.u32 4294901760, %v9046_v6  ;;  %v9053_v29 = vand.u32 4294901760, %v7424_v17 }
 0x1a8   :  { %v860_v41 = vpop.f32.mrb[4].mxu0 }
 0x1a9   :  { %v960_v43 = vsub.f32 %v9046_v6, %v959_v9  ;;  %v9059_v27 = vsub.f32 %v7424_v17, %v9053_v29  ;;  %v7425_v0 = vadd.f32 %v860_v41, %v8942_v52  ;;  %v5652_v30 = vpop.f32.mrb[5].mxu0  ;;  %6506 = vmatmul.mubr.f32.vlgmr.msra.gmra.mrb[20].mxu0 %v8122_v40  ;;  %v10234_v17 = vld [vmem:[#allocation39_spill] sm:$0xff] }
 0x1aa   :  { %6508 = vmatprep.mubr.msk.f32.mxu0 %vm7918_vm0, %v10186_v33  ;;  %7272 = vmatpush3.bf16.msra.mxu0 %v8854_v58  ;;  %v10241_v30 = vld [vmem:[#allocation27_spill] sm:$0xff] }
 0x1ab   :  { %v961_v34 = vand.u32 4294901760, %v960_v43  ;;  %v9066_v50 = vand.u32 4294901760, %v7425_v0  ;;  %v969_v25 = vand.u32 4294901760, %v9059_v27  ;;  %7273 = vmatprep.subr.bf16.mxu0 %v10187_v11 }
 0x1ac   :  { %v866_v18 = vpop.f32.mrb[6].mxu0 }
 0x1ad   :  { %v9071_v63 = vsub.f32 %v7425_v0, %v9066_v50  ;;  %v7426_v52 = vadd.f32 %v866_v18, %v8952_v21  ;;  %v5655_v51 = vpop.f32.mrb[7].mxu0  ;;  %5692 = vmatmul.mubr.f32.vlgmr.msra.gmra.mrb[10].mxu1 %v961_v34  ;;  %6509 = vmatmul.mubr.f32.gmra.mrb[22].mxu0 %v8132_v48  ;;  %v970_v58 = vsub.f32 %v9059_v27, %v969_v25  ;;  %v10242_v34 = vld [vmem:[#allocation29_spill] sm:$0xff] }
 0x1ae   :  { %6909 = vmatpush3.bf16.msra.mxu1 %v10233_v22  ;;  %5694 = vmatprep.mubr.msk.f32.mxu1 %vm7918_vm0, %v10186_v33  ;;  %v10243_v18 = vld [vmem:[#allocation33_spill] sm:$0xff] }
 0x1af   :  { %v9081_v15 = vand.u32 4294901760, %v7426_v52  ;;  %6910 = vmatprep.subr.bf16.mxu1 %v10187_v11  ;;  %6511 = vmatprep.mubr.msk.f32.mxu0 %vm7918_vm0, %v10186_v33  ;;  %v971_v21 = vand.u32 4294901760, %v970_v58  ;;  %v979_v35 = vand.u32 4294901760, %v9071_v63  ;;  %v10246_v58 = vld [vmem:[#allocation31_spill] sm:$0xff] }
 0x1b0   :  { %v872_v37 = vpop.f32.mrb[8].mxu0  ;;  %7275 = vmatpush3.bf16.msra.mxu0 %v8874_v4 }
 0x1b1   :  { %v9089_v47 = vsub.f32 %v7426_v52, %v9081_v15  ;;  %v7427_v54 = vadd.f32 %v872_v37, %v8962_v23  ;;  %v5658_v49 = vpop.f32.mrb[9].mxu0  ;;  %5695 = vmatmul.mubr.f32.gmra.mrb[12].mxu1 %v971_v21  ;;  %6512 = vmatmul.mubr.f32.gmra.mrb[24].mxu0 %v8148_v56  ;;  %v980_v62 = vsub.f32 %v9071_v63, %v979_v35  ;;  %v10244_v52 = vld [vmem:[#allocation30_spill] sm:$0xff]  ;;  %v10247_v21 = vand.u32 4294901760, %v10246_v58 }
 0x1b2   :  { %6912 = vmatpush3.bf16.msra.mxu1 %v8731_v44  ;;  %5697 = vmatprep.mubr.msk.f32.mxu1 %vm7918_vm0, %v10186_v33  ;;  %v10245_v51 = vand.u32 4294901760, %v10244_v52 }
 0x1b3   :  { %v9099_v13 = vand.u32 4294901760, %v7427_v54  ;;  %6913 = vmatprep.subr.bf16.mxu1 %v10187_v11  ;;  %6514 = vmatprep.mubr.msk.f32.mxu0 %vm7918_vm0, %v10186_v33  ;;  %v981_v4 = vand.u32 4294901760, %v980_v62  ;;  %v989_v23 = vand.u32 4294901760, %v9089_v47  ;;  %v10250_v62 = vld [vmem:[#allocation35_spill] sm:$0xff] }
 0x1b4   :  { %7276 = vmatprep.subr.bf16.mxu0 %v10187_v11  ;;  %v9238_v37 = vpack.c.bf16 %v10247_v21, %v10245_v51  ;;  %v10261_v21 = vand.u32 4294901760, %v8795_v24 }
 0x1b5   :  { %v9107_v57 = vsub.f32 %v7427_v54, %v9099_v13  ;;  %5698 = vmatmul.mubr.f32.gmra.mrb[14].mxu1 %v981_v4  ;;  %6515 = vmatmul.mubr.f32.gmra.mrb[26].mxu0 %v8169_v5  ;;  %v990_v2 = vsub.f32 %v9089_v47, %v989_v23  ;;  %v10248_v54 = vld [vmem:[#allocation34_spill] sm:$0xff]  ;;  %v10251_v4 = vand.u32 4294901760, %v10250_v62  ;;  %v10264_v62 = vand.u32 4294901760, %v8837_v10 }
 0x1b6   :  { %6915 = vmatpush3.bf16.msra.mxu1 %v10234_v17  ;;  %5700 = vmatprep.mubr.msk.f32.mxu1 %vm7918_vm0, %v10186_v33  ;;  %v10249_v49 = vand.u32 4294901760, %v10248_v54 }
 0x1b7   :  { %6916 = vmatprep.subr.bf16.mxu1 %v10187_v11  ;;  %6517 = vmatprep.mubr.msk.f32.mxu0 %vm7918_vm0, %v10186_v33  ;;  %v991_v8 = vand.u32 4294901760, %v990_v2  ;;  %v999_v41 = vand.u32 4294901760, %v9107_v57 }
 0x1b8   :  { %7278 = vmatpush3.bf16.msra.mxu0 %v8887_v59  ;;  %v10235_v59 = vld [vmem:[#allocation40_spill] sm:$0xff]  ;;  %v9250_v2 = vpack.c.bf16 %v10251_v4, %v10249_v49  ;;  %v10265_v4 = vand.u32 4294901760, %v8842_v45 }
 0x1b9   :  { %5701 = vmatmul.mubr.f32.gmra.mrb[16].mxu1 %v991_v8  ;;  %6518 = vmatmul.mubr.f32.gmra.mrb[28].mxu0 %v8192_v28  ;;  %v1000_v43 = vsub.f32 %v9107_v57, %v999_v41  ;;  %v10254_v8 = vld [vmem:[#allocation38_spill] sm:$0xff] }
 0x1ba   :  { %6918 = vmatpush3.bf16.msra.mxu1 %v8798_v42  ;;  %5703 = vmatprep.mubr.msk.f32.mxu1 %vm7918_vm0, %v10186_v33 }
 0x1bb   :  { %6919 = vmatprep.subr.bf16.mxu1 %v10187_v11  ;;  %6532 = vmatprep.mubr.msk.f32.mxu0 %vm7918_vm0, %v10186_v33  ;;  %v1001_v0 = vand.u32 4294901760, %v1000_v43  ;;  %v10255_v43 = vand.u32 4294901760, %v10254_v8 }
 0x1bc   :  { %7327 = vmatprep.subr.bf16.mxu0 %v10187_v11 }
 0x1bd   :  { %5704 = vmatmul.mubr.f32.gmra.mrb[18].mxu1 %v1001_v0  ;;  %6533 = vmatmul.mubr.f32.vlgmr.msra.gmra.mrb[20].mxu0 %v8122_v40  ;;  %v10236_v40 = vld [vmem:[#allocation22_spill] sm:$0xff] }
 0x1be   :  { %6921 = vmatpush3.bf16.msra.mxu1 %v8806_v14  ;;  %6535 = vmatprep.mubr.msk.f32.mxu0 %vm7918_vm0, %v10186_v33 }
 0x1bf   :  { %6922 = vmatprep.subr.bf16.mxu1 %v10187_v11  ;;  %5738 = vmatprep.mubr.msk.f32.mxu1 %vm7918_vm0, %v10186_v33 }
 0x1c0   :  { %7329 = vmatpush3.bf16.msra.mxu0 %v8892_v38 }
 0x1c1   :  { %6536 = vmatmul.mubr.f32.gmra.mrb[22].mxu0 %v8132_v48  ;;  %7330 = vmatprep.subr.bf16.mxu0 %v10187_v11  ;;  %v10237_v48 = vld [vmem:[#allocation23_spill] sm:$0xff] }
 0x1c2   :  { %6924 = vmatpush3.bf16.msra.mxu1 %v10235_v59  ;;  %6538 = vmatprep.mubr.msk.f32.mxu0 %vm7918_vm0, %v10186_v33 }
 0x1c3   :  { %6925 = vmatprep.subr.bf16.mxu1 %v10187_v11 }
 0x1c4   :  { %7332 = vmatpush3.bf16.msra.mxu0 %v8907_v36 }
 0x1c5   :  { %6539 = vmatmul.mubr.f32.gmra.mrb[24].mxu0 %v8148_v56  ;;  %7333 = vmatprep.subr.bf16.mxu0 %v10187_v11  ;;  %v10238_v56 = vld [vmem:[#allocation24_spill] sm:$0xff] }
 0x1c6   :  { %6927 = vmatpush3.bf16.msra.mxu1 %v8865_v12  ;;  %6541 = vmatprep.mubr.msk.f32.mxu0 %vm7918_vm0, %v10186_v33 }
 0x1c7   :  { %6928 = vmatprep.subr.bf16.mxu1 %v10187_v11 }
 0x1c8   :  { %7335 = vmatpush3.bf16.msra.mxu0 %v8922_v7 }
 0x1c9   :  { %6542 = vmatmul.mubr.f32.gmra.mrb[26].mxu0 %v8169_v5  ;;  %7336 = vmatprep.subr.bf16.mxu0 %v10187_v11  ;;  %v10239_v5 = vld [vmem:[#allocation25_spill] sm:$0xff] }
 0x1ca   :  { %6930 = vmatpush3.bf16.msra.mxu1 %v8877_v46  ;;  %6544 = vmatprep.mubr.msk.f32.mxu0 %vm7918_vm0, %v10186_v33 }
 0x1cb   :  { %6931 = vmatprep.subr.bf16.mxu1 %v10187_v11 }
 0x1cc   :  { %7338 = vmatpush3.bf16.msra.mxu0 %v8937_v60 }
 0x1cd   :  { %5739 = vmatmul.mubr.f32.vlgmr.msra.gmra.mrb[10].mxu1 %v9043_v31  ;;  %6545 = vmatmul.mubr.f32.gmra.mrb[28].mxu0 %v8192_v28  ;;  %v10240_v28 = vld [vmem:[#allocation26_spill] sm:$0xff] }
 0x1ce   :  { %6933 = vmatpush3.bf16.msra.mxu1 %v8892_v38  ;;  %5741 = vmatprep.mubr.msk.f32.mxu1 %vm7918_vm0, %v10186_v33 }
 0x1cf   :  { %6934 = vmatprep.subr.bf16.mxu1 %v10187_v11  ;;  %7339 = vmatprep.subr.bf16.mxu0 %v10187_v11 }
 0x1d0   :  { %7341 = vmatpush3.bf16.msra.mxu0 %v8947_v20  ;;  %6673 = vmatprep.mubr.msk.f32.mxu0 %vm7918_vm0, %v10186_v33 }
 0x1d1   :  { %5742 = vmatmul.mubr.f32.gmra.mrb[12].mxu1 %v9053_v29  ;;  %7342 = vmatprep.subr.bf16.mxu0 %v10187_v11 }
 0x1d2   :  { %6936 = vmatpush3.bf16.msra.mxu1 %v8907_v36  ;;  %5744 = vmatprep.mubr.msk.f32.mxu1 %vm7918_vm0, %v10186_v33 }
 0x1d3   :  { %6937 = vmatprep.subr.bf16.mxu1 %v10187_v11 }
 0x1d4   :  { %7344 = vmatpush3.bf16.msra.mxu0 %v8957_v61 }
 0x1d5   :  { %5745 = vmatmul.mubr.f32.gmra.mrb[14].mxu1 %v9066_v50  ;;  %7345 = vmatprep.subr.bf16.mxu0 %v10187_v11 }
 0x1d6   :  { %6939 = vmatpush3.bf16.msra.mxu1 %v8922_v7  ;;  %5747 = vmatprep.mubr.msk.f32.mxu1 %vm7918_vm0, %v10186_v33 }
 0x1d7   :  { %6940 = vmatprep.subr.bf16.mxu1 %v10187_v11 }
 0x1d8   :  { %7347 = vmatpush3.bf16.msra.mxu0 %v8967_v55 }
 0x1d9   :  { %5748 = vmatmul.mubr.f32.gmra.mrb[16].mxu1 %v9081_v15  ;;  %7348 = vmatprep.subr.bf16.mxu0 %v10187_v11 }
 0x1da   :  { %6942 = vmatpush3.bf16.msra.mxu1 %v8937_v60  ;;  %5750 = vmatprep.mubr.msk.f32.mxu1 %vm7918_vm0, %v10186_v33 }
 0x1db   :  { %6943 = vmatprep.subr.bf16.mxu1 %v10187_v11 }
 0x1dc   :  { %7350 = vmatpush3.bf16.msra.mxu0 %v8974_v32 }
 0x1dd   :  { %5751 = vmatmul.mubr.f32.gmra.mrb[18].mxu1 %v9099_v13  ;;  %7351 = vmatprep.subr.bf16.mxu0 %v10187_v11 }
 0x1de   :  { %6945 = vmatpush3.bf16.msra.mxu1 %v8947_v20  ;;  %5785 = vmatprep.mubr.msk.f32.mxu1 %vm7918_vm0, %v10186_v33 }
 0x1df   :  { %6946 = vmatprep.subr.bf16.mxu1 %v10187_v11 }
 0x1e2   :  { %6948 = vmatpush3.bf16.msra.mxu1 %v8957_v61 }
 0x1e3   :  { %6949 = vmatprep.subr.bf16.mxu1 %v10187_v11 }
 0x1e6   :  { %6951 = vmatpush3.bf16.msra.mxu1 %v8967_v55 }
 0x1e7   :  { %6952 = vmatprep.subr.bf16.mxu1 %v10187_v11 }
 0x1ea   :  { %6954 = vmatpush3.bf16.msra.mxu1 %v8974_v32 }
 0x1eb   :  { %6955 = vmatprep.subr.bf16.mxu1 %v10187_v11 }
 0x1ed   :  { %5786 = vmatmul.mubr.f32.vlgmr.msra.gmra.mrb[10].mxu1 %v9046_v6  ;;  %v10252_v6 = vld [vmem:[#allocation37_spill] sm:$0xff] }
 0x1ee   :  { %6957 = vmatpush3.bf16.msra.mxu1 %v10236_v40  ;;  %5788 = vmatprep.mubr.msk.f32.mxu1 %vm7918_vm0, %v10186_v33 }
 0x1ef   :  { %6958 = vmatprep.subr.bf16.mxu1 %v10187_v11 }
 0x1f1   :  { %5789 = vmatmul.mubr.f32.gmra.mrb[12].mxu1 %v9059_v27  ;;  %v10256_v27 = vand.u32 4294901760, %v8742_v3  ;;  %v10259_v3 = vand.u32 4294901760, %v8769_v39 }
 0x1f2   :  { %6960 = vmatpush3.bf16.msra.mxu1 %v10237_v48  ;;  %5791 = vmatprep.mubr.msk.f32.mxu1 %vm7918_vm0, %v10186_v33 }
 0x1f3   :  { %6961 = vmatprep.subr.bf16.mxu1 %v10187_v11 }
 0x1f5   :  { %5792 = vmatmul.mubr.f32.gmra.mrb[14].mxu1 %v9071_v63 }
 0x1f6   :  { %6963 = vmatpush3.bf16.msra.mxu1 %v10238_v56  ;;  %5794 = vmatprep.mubr.msk.f32.mxu1 %vm7918_vm0, %v10186_v33 }
 0x1f7   :  { %6964 = vmatprep.subr.bf16.mxu1 %v10187_v11 }
 0x1f9   :  { %5795 = vmatmul.mubr.f32.gmra.mrb[16].mxu1 %v9089_v47 }
 0x1fa   :  { %6966 = vmatpush3.bf16.msra.mxu1 %v10239_v5  ;;  %5797 = vmatprep.mubr.msk.f32.mxu1 %vm7918_vm0, %v10186_v33 }
 0x1fb   :  { %6967 = vmatprep.subr.bf16.mxu1 %v10187_v11 }
 0x1fd   :  { %5798 = vmatmul.mubr.f32.gmra.mrb[18].mxu1 %v9107_v57  ;;  %v10262_v57 = vand.u32 4294901760, %v8817_v1 }
 0x1fe   :  { %6969 = vmatpush3.bf16.msra.mxu1 %v10240_v28  ;;  %5832 = vmatprep.mubr.msk.f32.mxu1 %vm7918_vm0, %v10186_v33 }
 0x1ff   :  { %6970 = vmatprep.subr.bf16.mxu1 %v10187_v11 }
 0x202   :  { %6972 = vmatpush3.bf16.msra.mxu1 %v10241_v30 }
 0x203   :  { %6973 = vmatprep.subr.bf16.mxu1 %v10187_v11 }
 0x206   :  { %6975 = vmatpush3.bf16.msra.mxu1 %v10242_v34 }
 0x207   :  { %6976 = vmatprep.subr.bf16.mxu1 %v10187_v11 }
 0x20a   :  { %6978 = vmatpush3.bf16.msra.mxu1 %v10243_v18 }
 0x20b   :  { %6979 = vmatprep.subr.bf16.mxu1 %v10187_v11 }
 0x20d   :  { %5833 = vmatmul.mubr.f32.vlgmr.msra.gmra.mrb[10].mxu1 %v959_v9  ;;  %v10253_v9 = vand.u32 4294901760, %v10252_v6  ;;  %v9322_v6 = vpack.c.bf16 %v10265_v4, %v10264_v62 }
 0x20e   :  { %6981 = vmatpush3.bf16.msra.mxu1 %v9238_v37  ;;  %5835 = vmatprep.mubr.msk.f32.mxu1 %vm7918_vm0, %v10186_v33 }
 0x20f   :  { %6982 = vmatprep.subr.bf16.mxu1 %v10187_v11  ;;  %v9262_v0 = vpack.c.bf16 %v10255_v43, %v10253_v9 }
 0x211   :  { %5836 = vmatmul.mubr.f32.gmra.mrb[12].mxu1 %v969_v25  ;;  %v10257_v25 = vand.u32 4294901760, %v8748_v26 }
 0x212   :  { %6984 = vmatpush3.bf16.msra.mxu1 %v9250_v2  ;;  %5838 = vmatprep.mubr.msk.f32.mxu1 %vm7918_vm0, %v10186_v33 }
 0x213   :  { %6985 = vmatprep.subr.bf16.mxu1 %v10187_v11  ;;  %v9274_v52 = vpack.c.bf16 %v10257_v25, %v10256_v27 }
 0x215   :  { %5839 = vmatmul.mubr.f32.gmra.mrb[14].mxu1 %v979_v35  ;;  %v10258_v35 = vand.u32 4294901760, %v8764_v16 }
 0x216   :  { %6987 = vmatpush3.bf16.msra.mxu1 %v9262_v0  ;;  %5841 = vmatprep.mubr.msk.f32.mxu1 %vm7918_vm0, %v10186_v33 }
 0x217   :  { %6988 = vmatprep.subr.bf16.mxu1 %v10187_v11  ;;  %v9288_v26 = vpack.c.bf16 %v10259_v3, %v10258_v35 }
 0x218   :  { %v9277_v51 = vpop.f32.mrb[10].mxu0 }
 0x219   :  { %5842 = vmatmul.mubr.f32.gmra.mrb[16].mxu1 %v989_v23  ;;  %v6090_v63 = vpop.f32.mrb[11].mxu0  ;;  %v10260_v23 = vand.u32 4294901760, %v8790_v19  ;;  %v9377_v10 = vand.u32 4294901760, %v9277_v51 }
 0x21a   :  { %6990 = vmatpush3.bf16.msra.mxu1 %v9274_v52  ;;  %5844 = vmatprep.mubr.msk.f32.mxu1 %vm7918_vm0, %v10186_v33 }
 0x21b   :  { %6991 = vmatprep.subr.bf16.mxu1 %v10187_v11  ;;  %v9300_v54 = vpack.c.bf16 %v10261_v21, %v10260_v23  ;;  %v9386_v45 = vsub.f32 %v9277_v51, %v9377_v10 }
 0x21c   :  { %v9291_v58 = vpop.f32.mrb[12].mxu0 }
 0x21d   :  { %5845 = vmatmul.mubr.f32.gmra.mrb[18].mxu1 %v999_v41  ;;  %v6093_v47 = vpop.f32.mrb[13].mxu0  ;;  %v10263_v41 = vand.u32 4294901760, %v8823_v53 }
 0x21e   :  { %6993 = vmatpush3.bf16.msra.mxu1 %v9288_v26  ;;  %5879 = vmatprep.mubr.msk.f32.mxu1 %vm7918_vm0, %v10186_v33 }
 0x21f   :  { %6994 = vmatprep.subr.bf16.mxu1 %v10187_v11  ;;  %v9312_v49 = vpack.c.bf16 %v10263_v41, %v10262_v57 }
 0x220   :  { %v9305_v16 = vpop.f32.mrb[14].mxu0 }
 0x221   :  { %v6096_v39 = vpop.f32.mrb[15].mxu0 }
 0x222   :  { %6996 = vmatpush3.bf16.msra.mxu1 %v9300_v54 }
 0x223   :  { %6997 = vmatprep.subr.bf16.mxu1 %v10187_v11 }
 0x224   :  { %v9315_v24 = vpop.f32.mrb[16].mxu0 }
 0x225   :  { %v6099_v19 = vpop.f32.mrb[17].mxu0  ;;  %v9415_v43 = vand.u32 4294901760, %v9315_v24 }
 0x226   :  { %6999 = vmatpush3.bf16.msra.mxu1 %v9312_v49 }
 0x227   :  { %7000 = vmatprep.subr.bf16.mxu1 %v10187_v11  ;;  %v9422_v51 = vsub.f32 %v9315_v24, %v9415_v43 }
 0x228   :  { %v9325_v1 = vpop.f32.mrb[18].mxu0 }
 0x229   :  { %v6102_v53 = vpop.f32.mrb[19].mxu0  ;;  %v9425_v63 = vand.u32 4294901760, %v9325_v1  ;;  %v2490_v3 = vand.u32 4294901760, %v9422_v51 }
 0x22a   :  { %7002 = vmatpush3.bf16.msra.mxu1 %v9322_v6 }
 0x22b   :  { %7003 = vmatprep.subr.bf16.mxu1 %v10187_v11  ;;  %v2491_v39 = vsub.f32 %v9422_v51, %v2490_v3 }
 0x22d   :  { %5880 = vmatmul.mubr.f32.vlgmr.msra.gmra.mrb[10].mxu1 %v9043_v31  ;;  %v2492_v57 = vand.u32 4294901760, %v2491_v39 }
 0x22e   :  { %7005 = vmatpush3.bf16.msra.mxu1 %v10236_v40  ;;  %5882 = vmatprep.mubr.msk.f32.mxu1 %vm7918_vm0, %v10186_v33 }
 0x22f   :  { %7006 = vmatprep.subr.bf16.mxu1 %v10187_v11 }
 0x231   :  { %5883 = vmatmul.mubr.f32.gmra.mrb[12].mxu1 %v9053_v29 }
 0x232   :  { %7008 = vmatpush3.bf16.msra.mxu1 %v10237_v48  ;;  %5885 = vmatprep.mubr.msk.f32.mxu1 %vm7918_vm0, %v10186_v33 }
 0x233   :  { %7009 = vmatprep.subr.bf16.mxu1 %v10187_v11 }
 0x235   :  { %5886 = vmatmul.mubr.f32.gmra.mrb[14].mxu1 %v9066_v50 }
 0x236   :  { %7011 = vmatpush3.bf16.msra.mxu1 %v10238_v56  ;;  %5888 = vmatprep.mubr.msk.f32.mxu1 %vm7918_vm0, %v10186_v33 }
 0x237   :  { %7012 = vmatprep.subr.bf16.mxu1 %v10187_v11 }
 0x239   :  { %5889 = vmatmul.mubr.f32.gmra.mrb[16].mxu1 %v9081_v15 }
 0x23a   :  { %7014 = vmatpush3.bf16.msra.mxu1 %v10239_v5  ;;  %5891 = vmatprep.mubr.msk.f32.mxu1 %vm7918_vm0, %v10186_v33 }
 0x23b   :  { %7015 = vmatprep.subr.bf16.mxu1 %v10187_v11 }
 0x23d   :  { %5892 = vmatmul.mubr.f32.gmra.mrb[18].mxu1 %v9099_v13 }
 0x23e   :  { %7017 = vmatpush3.bf16.msra.mxu1 %v10240_v28  ;;  %5926 = vmatprep.mubr.msk.f32.mxu1 %vm7918_vm0, %v10186_v33 }
 0x23f   :  { %7018 = vmatprep.subr.bf16.mxu1 %v10187_v11 }
 0x242   :  { %7020 = vmatpush3.bf16.msra.mxu1 %v10241_v30 }
 0x243   :  { %7021 = vmatprep.subr.bf16.mxu1 %v10187_v11 }
 0x246   :  { %7023 = vmatpush3.bf16.msra.mxu1 %v10242_v34 }
 0x247   :  { %7024 = vmatprep.subr.bf16.mxu1 %v10187_v11 }
 0x24a   :  { %7026 = vmatpush3.bf16.msra.mxu1 %v10243_v18 }
 0x24b   :  { %7081 = vmatprep.subr.bf16.mxu1 %v10187_v11 }
 0x24d   :  { %5927 = vmatmul.mubr.f32.vlgmr.msra.gmra.mrb[10].mxu1 %v9043_v31  ;;  %v9392_v31 = vand.u32 4294901760, %v9291_v58 }
 0x24e   :  { %7083 = vmatpush3.bf16.msra.mxu1 %v10236_v40  ;;  %5929 = vmatprep.mubr.msk.f32.mxu1 %vm7918_vm0, %v10186_v33 }
 0x24f   :  { %7084 = vmatprep.subr.bf16.mxu1 %v10187_v11 }
 0x251   :  { %5930 = vmatmul.mubr.f32.gmra.mrb[12].mxu1 %v9053_v29  ;;  %v2460_v29 = vand.u32 4294901760, %v9386_v45 }
 0x252   :  { %7086 = vmatpush3.bf16.msra.mxu1 %v10237_v48  ;;  %5932 = vmatprep.mubr.msk.f32.mxu1 %vm7918_vm0, %v10186_v33 }
 0x253   :  { %7087 = vmatprep.subr.bf16.mxu1 %v10187_v11 }
 0x255   :  { %5933 = vmatmul.mubr.f32.gmra.mrb[14].mxu1 %v9066_v50  ;;  %v9399_v50 = vsub.f32 %v9291_v58, %v9392_v31  ;;  %v9437_v58 = vsub.f32 %v9325_v1, %v9425_v63 }
 0x256   :  { %7089 = vmatpush3.bf16.msra.mxu1 %v10238_v56  ;;  %5935 = vmatprep.mubr.msk.f32.mxu1 %vm7918_vm0, %v10186_v33 }
 0x257   :  { %7090 = vmatprep.subr.bf16.mxu1 %v10187_v11  ;;  %v2470_v9 = vand.u32 4294901760, %v9399_v50  ;;  %v2500_v21 = vand.u32 4294901760, %v9437_v58 }
 0x259   :  { %5936 = vmatmul.mubr.f32.gmra.mrb[16].mxu1 %v9081_v15  ;;  %v9402_v15 = vand.u32 4294901760, %v9305_v16  ;;  %v2471_v35 = vsub.f32 %v9399_v50, %v2470_v9  ;;  %v2501_v41 = vsub.f32 %v9437_v58, %v2500_v21 }
 0x25a   :  { %7092 = vmatpush3.bf16.msra.mxu1 %v10239_v5  ;;  %5938 = vmatprep.mubr.msk.f32.mxu1 %vm7918_vm0, %v10186_v33 }
 0x25b   :  { %7093 = vmatprep.subr.bf16.mxu1 %v10187_v11  ;;  %v9412_v8 = vsub.f32 %v9305_v16, %v9402_v15  ;;  %v2472_v47 = vand.u32 4294901760, %v2471_v35  ;;  %v2502_v24 = vand.u32 4294901760, %v2501_v41 }
 0x25d   :  { %5939 = vmatmul.mubr.f32.gmra.mrb[18].mxu1 %v9099_v13  ;;  %v2461_v13 = vsub.f32 %v9386_v45, %v2460_v29  ;;  %v2480_v25 = vand.u32 4294901760, %v9412_v8 }
 0x25e   :  { %7095 = vmatpush3.bf16.msra.mxu1 %v10240_v28  ;;  %6135 = vmatprep.mubr.msk.f32.mxu1 %vm7918_vm0, %v10186_v33 }
 0x25f   :  { %7096 = vmatprep.subr.bf16.mxu1 %v10187_v11  ;;  %v2462_v27 = vand.u32 4294901760, %v2461_v13  ;;  %v2481_v23 = vsub.f32 %v9412_v8, %v2480_v25 }
 0x261   :  { %v2482_v16 = vand.u32 4294901760, %v2481_v23 }
 0x262   :  { %7098 = vmatpush3.bf16.msra.mxu1 %v10241_v30 }
 0x263   :  { %7099 = vmatprep.subr.bf16.mxu1 %v10187_v11 }
 0x266   :  { %7101 = vmatpush3.bf16.msra.mxu1 %v10242_v34 }
 0x267   :  { %7102 = vmatprep.subr.bf16.mxu1 %v10187_v11 }
 0x26a   :  { %7104 = vmatpush3.bf16.msra.mxu1 %v10243_v18 }
 0x26b   :  { %7105 = vmatprep.subr.bf16.mxu1 %v10187_v11 }
 0x26d   :  { %6136 = vmatmul.mubr.f32.vlgmr.msra.gmra.mrb[20].mxu1 %v2462_v27 }
 0x26e   :  { %7107 = vmatpush3.bf16.msra.mxu1 %v10233_v22  ;;  %6138 = vmatprep.mubr.msk.f32.mxu1 %vm7918_vm0, %v10186_v33 }
 0x26f   :  { %7108 = vmatprep.subr.bf16.mxu1 %v10187_v11 }
 0x271   :  { %6139 = vmatmul.mubr.f32.gmra.mrb[22].mxu1 %v2472_v47 }
 0x272   :  { %7110 = vmatpush3.bf16.msra.mxu1 %v8731_v44  ;;  %6141 = vmatprep.mubr.msk.f32.mxu1 %vm7918_vm0, %v10186_v33 }
 0x273   :  { %7111 = vmatprep.subr.bf16.mxu1 %v10187_v11 }
 0x275   :  { %6142 = vmatmul.mubr.f32.gmra.mrb[24].mxu1 %v2482_v16 }
 0x276   :  { %7113 = vmatpush3.bf16.msra.mxu1 %v10234_v17  ;;  %6144 = vmatprep.mubr.msk.f32.mxu1 %vm7918_vm0, %v10186_v33 }
 0x277   :  { %7114 = vmatprep.subr.bf16.mxu1 %v10187_v11 }
 0x279   :  { %6145 = vmatmul.mubr.f32.gmra.mrb[26].mxu1 %v2492_v57 }
 0x27a   :  { %7116 = vmatpush3.bf16.msra.mxu1 %v8798_v42  ;;  %6147 = vmatprep.mubr.msk.f32.mxu1 %vm7918_vm0, %v10186_v33 }
 0x27b   :  { %7117 = vmatprep.subr.bf16.mxu1 %v10187_v11 }
 0x27d   :  { %6148 = vmatmul.mubr.f32.gmra.mrb[28].mxu1 %v2502_v24 }
 0x27e   :  { %7119 = vmatpush3.bf16.msra.mxu1 %v8806_v14  ;;  %6182 = vmatprep.mubr.msk.f32.mxu1 %vm7918_vm0, %v10186_v33 }
 0x27f   :  { %7120 = vmatprep.subr.bf16.mxu1 %v10187_v11 }
 0x282   :  { %7122 = vmatpush3.bf16.msra.mxu1 %v10235_v59 }
 0x283   :  { %7123 = vmatprep.subr.bf16.mxu1 %v10187_v11 }
 0x286   :  { %7125 = vmatpush3.bf16.msra.mxu1 %v8865_v12 }
 0x287   :  { %7126 = vmatprep.subr.bf16.mxu1 %v10187_v11 }
 0x28a   :  { %7128 = vmatpush3.bf16.msra.mxu1 %v8877_v46 }
 0x28b   :  { %7129 = vmatprep.subr.bf16.mxu1 %v10187_v11 }
 0x28d   :  { %6183 = vmatmul.mubr.f32.vlgmr.msra.gmra.mrb[20].mxu1 %v9377_v10 }
 0x28e   :  { %7131 = vmatpush3.bf16.msra.mxu1 %v8892_v38  ;;  %6185 = vmatprep.mubr.msk.f32.mxu1 %vm7918_vm0, %v10186_v33 }
 0x28f   :  { %7132 = vmatprep.subr.bf16.mxu1 %v10187_v11 }
 0x290   :  { %v3856_v19 = vpop.f32.mrb[20].mxu0 }
 0x291   :  { %6186 = vmatmul.mubr.f32.gmra.mrb[22].mxu1 %v9392_v31  ;;  %v9478_v62 = vand.u32 4294901760, %v3856_v19  ;;  %v6534_v4 = vpop.f32.mrb[21].mxu0 }
 0x292   :  { %7134 = vmatpush3.bf16.msra.mxu1 %v8907_v36  ;;  %6188 = vmatprep.mubr.msk.f32.mxu1 %vm7918_vm0, %v10186_v33 }
 0x293   :  { %v9484_v1 = vsub.f32 %v3856_v19, %v9478_v62  ;;  %7135 = vmatprep.subr.bf16.mxu1 %v10187_v11 }
 0x294   :  { %v3862_v38 = vpop.f32.mrb[22].mxu0 }
 0x295   :  { %v3967_v53 = vand.u32 4294901760, %v9484_v1  ;;  %6189 = vmatmul.mubr.f32.gmra.mrb[24].mxu1 %v9402_v15  ;;  %v9489_v13 = vand.u32 4294901760, %v3862_v38  ;;  %v6537_v27 = vpop.f32.mrb[23].mxu0  ;;  %6674 = vmatmul.mubr.f32.vlgmr.msra.gmra.mrb[30].mxu0 %v9484_v1 }
 0x296   :  { %7137 = vmatpush3.bf16.msra.mxu1 %v8922_v7  ;;  %7353 = vmatpush3.bf16.msra.mxu0 %v10236_v40 }
 0x297   :  { %v9497_v36 = vsub.f32 %v9484_v1, %v3967_v53  ;;  %v9500_v35 = vsub.f32 %v3862_v38, %v9489_v13  ;;  %6191 = vmatprep.mubr.msk.f32.mxu1 %vm7918_vm0, %v10186_v33  ;;  %7138 = vmatprep.subr.bf16.mxu1 %v10187_v11 }
 0x298   :  { %v3868_v47 = vpop.f32.mrb[24].mxu0  ;;  %6676 = vmatprep.mubr.msk.f32.mxu0 %vm7918_vm0, %v10186_v33  ;;  %7354 = vmatprep.subr.bf16.mxu0 %v10187_v11 }
 0x299   :  { %6192 = vmatmul.mubr.f32.gmra.mrb[26].mxu1 %v9415_v43  ;;  %v9509_v7 = vand.u32 4294901760, %v3868_v47  ;;  %v6540_v23 = vpop.f32.mrb[25].mxu0  ;;  %6677 = vmatmul.mubr.f32.gmra.mrb[32].mxu0 %v9500_v35  ;;  %v3977_v16 = vand.u32 4294901760, %v9500_v35 }
 0x29a   :  { %7140 = vmatpush3.bf16.msra.mxu1 %v8937_v60  ;;  %7356 = vmatpush3.bf16.msra.mxu0 %v10237_v48 }
 0x29b   :  { %v9516_v39 = vsub.f32 %v3868_v47, %v9509_v7  ;;  %6194 = vmatprep.mubr.msk.f32.mxu1 %vm7918_vm0, %v10186_v33  ;;  %7141 = vmatprep.subr.bf16.mxu1 %v10187_v11  ;;  %v9524_v57 = vsub.f32 %v9500_v35, %v3977_v16 }
 0x29c   :  { %v3874_v41 = vpop.f32.mrb[26].mxu0  ;;  %6679 = vmatprep.mubr.msk.f32.mxu0 %vm7918_vm0, %v10186_v33  ;;  %7357 = vmatprep.subr.bf16.mxu0 %v10187_v11 }
 0x29d   :  { %6195 = vmatmul.mubr.f32.gmra.mrb[28].mxu1 %v9425_v63  ;;  %v9530_v60 = vand.u32 4294901760, %v3874_v41  ;;  %v6543_v24 = vpop.f32.mrb[27].mxu0  ;;  %6680 = vmatmul.mubr.f32.gmra.mrb[34].mxu0 %v9516_v39  ;;  %v3987_v19 = vand.u32 4294901760, %v9516_v39 }
 0x29e   :  { %7143 = vmatpush3.bf16.msra.mxu1 %v8947_v20  ;;  %7359 = vmatpush3.bf16.msra.mxu0 %v10238_v56 }
 0x29f   :  { %v9537_v4 = vsub.f32 %v3874_v41, %v9530_v60  ;;  %7144 = vmatprep.subr.bf16.mxu1 %v10187_v11  ;;  %6682 = vmatprep.mubr.msk.f32.mxu0 %vm7918_vm0, %v10186_v33  ;;  %v9543_v38 = vsub.f32 %v9516_v39, %v3987_v19 }
 0x2a0   :  { %v3880_v27 = vpop.f32.mrb[28].mxu0  ;;  %7360 = vmatprep.subr.bf16.mxu0 %v10187_v11  ;;  %6229 = vmatprep.mubr.msk.f32.mxu1 %vm7918_vm0, %v10186_v33 }
 0x2a1   :  { %v9548_v20 = vand.u32 4294901760, %v3880_v27  ;;  %v6546_v47 = vpop.f32.mrb[29].mxu0  ;;  %6683 = vmatmul.mubr.f32.gmra.mrb[36].mxu0 %v9537_v4  ;;  %v3997_v23 = vand.u32 4294901760, %v9537_v4 }
 0x2a2   :  { %7146 = vmatpush3.bf16.msra.mxu1 %v8957_v61  ;;  %7362 = vmatpush3.bf16.msra.mxu0 %v10239_v5 }
 0x2a3   :  { %v4006_v39 = vsub.f32 %v3880_v27, %v9548_v20  ;;  %7147 = vmatprep.subr.bf16.mxu1 %v10187_v11  ;;  %6685 = vmatprep.mubr.msk.f32.mxu0 %vm7918_vm0, %v10186_v33  ;;  %v9559_v41 = vsub.f32 %v9537_v4, %v3997_v23 }
 0x2a4   :  { %7363 = vmatprep.subr.bf16.mxu0 %v10187_v11 }
 0x2a5   :  { %6686 = vmatmul.mubr.f32.gmra.mrb[38].mxu0 %v4006_v39  ;;  %v4007_v24 = vand.u32 4294901760, %v4006_v39 }
 0x2a6   :  { %7149 = vmatpush3.bf16.msra.mxu1 %v8967_v55  ;;  %7365 = vmatpush3.bf16.msra.mxu0 %v10240_v28 }
 0x2a7   :  { %7150 = vmatprep.subr.bf16.mxu1 %v10187_v11  ;;  %7366 = vmatprep.subr.bf16.mxu0 %v10187_v11  ;;  %v9566_v61 = vsub.f32 %v4006_v39, %v4007_v24 }
 0x2a8   :  { %6720 = vmatprep.mubr.msk.f32.mxu0 %vm7918_vm0, %v10186_v33 }
 0x2aa   :  { %7152 = vmatpush3.bf16.msra.mxu1 %v8974_v32  ;;  %7368 = vmatpush3.bf16.msra.mxu0 %v10241_v30 }
 0x2ab   :  { %7153 = vmatprep.subr.bf16.mxu1 %v10187_v11  ;;  %7369 = vmatprep.subr.bf16.mxu0 %v10187_v11 }
 0x2ad   :  { %6230 = vmatmul.mubr.f32.vlgmr.msra.gmra.mrb[20].mxu1 %v9386_v45 }
 0x2ae   :  { %7155 = vmatpush3.bf16.msra.mxu1 %v10236_v40  ;;  %7371 = vmatpush3.bf16.msra.mxu0 %v10242_v34 }
 0x2af   :  { %6232 = vmatprep.mubr.msk.f32.mxu1 %vm7918_vm0, %v10186_v33  ;;  %7156 = vmatprep.subr.bf16.mxu1 %v10187_v11 }
 0x2b0   :  { %7372 = vmatprep.subr.bf16.mxu0 %v10187_v11 }
 0x2b1   :  { %6233 = vmatmul.mubr.f32.gmra.mrb[22].mxu1 %v9399_v50 }
 0x2b2   :  { %7158 = vmatpush3.bf16.msra.mxu1 %v10237_v48  ;;  %7374 = vmatpush3.bf16.msra.mxu0 %v10243_v18 }
 0x2b3   :  { %6235 = vmatprep.mubr.msk.f32.mxu1 %vm7918_vm0, %v10186_v33  ;;  %7159 = vmatprep.subr.bf16.mxu1 %v10187_v11 }
 0x2b4   :  { %7375 = vmatprep.subr.bf16.mxu0 %v10187_v11 }
 0x2b5   :  { %6236 = vmatmul.mubr.f32.gmra.mrb[24].mxu1 %v9412_v8  ;;  %6721 = vmatmul.mubr.f32.vlgmr.msra.gmra.mrb[30].mxu0 %v3967_v53 }
 0x2b6   :  { %7161 = vmatpush3.bf16.msra.mxu1 %v10238_v56  ;;  %7377 = vmatpush3.bf16.msra.mxu0 %v9238_v37 }
 0x2b7   :  { %6238 = vmatprep.mubr.msk.f32.mxu1 %vm7918_vm0, %v10186_v33  ;;  %6723 = vmatprep.mubr.msk.f32.mxu0 %vm7918_vm0, %v10186_v33 }
 0x2b8   :  { %7162 = vmatprep.subr.bf16.mxu1 %v10187_v11  ;;  %7378 = vmatprep.subr.bf16.mxu0 %v10187_v11 }
 0x2b9   :  { %6239 = vmatmul.mubr.f32.gmra.mrb[26].mxu1 %v9422_v51  ;;  %6724 = vmatmul.mubr.f32.gmra.mrb[32].mxu0 %v3977_v16 }
 0x2ba   :  { %7164 = vmatpush3.bf16.msra.mxu1 %v10239_v5  ;;  %7380 = vmatpush3.bf16.msra.mxu0 %v9250_v2 }
 0x2bb   :  { %6241 = vmatprep.mubr.msk.f32.mxu1 %vm7918_vm0, %v10186_v33  ;;  %6726 = vmatprep.mubr.msk.f32.mxu0 %vm7918_vm0, %v10186_v33 }
 0x2bc   :  { %7165 = vmatprep.subr.bf16.mxu1 %v10187_v11  ;;  %7381 = vmatprep.subr.bf16.mxu0 %v10187_v11 }
 0x2bd   :  { %6242 = vmatmul.mubr.f32.gmra.mrb[28].mxu1 %v9437_v58  ;;  %6727 = vmatmul.mubr.f32.gmra.mrb[34].mxu0 %v3987_v19 }
 0x2be   :  { %7167 = vmatpush3.bf16.msra.mxu1 %v10240_v28  ;;  %7383 = vmatpush3.bf16.msra.mxu0 %v9262_v0 }
 0x2bf   :  { %6729 = vmatprep.mubr.msk.f32.mxu0 %vm7918_vm0, %v10186_v33  ;;  %7168 = vmatprep.subr.bf16.mxu1 %v10187_v11 }
 0x2c0   :  { %7384 = vmatprep.subr.bf16.mxu0 %v10187_v11  ;;  %6276 = vmatprep.mubr.msk.f32.mxu1 %vm7918_vm0, %v10186_v33 }
 0x2c1   :  { %6730 = vmatmul.mubr.f32.gmra.mrb[36].mxu0 %v3997_v23 }
 0x2c2   :  { %7170 = vmatpush3.bf16.msra.mxu1 %v10241_v30  ;;  %7386 = vmatpush3.bf16.msra.mxu0 %v9274_v52 }
 0x2c3   :  { %6732 = vmatprep.mubr.msk.f32.mxu0 %vm7918_vm0, %v10186_v33  ;;  %7171 = vmatprep.subr.bf16.mxu1 %v10187_v11 }
 0x2c4   :  { %7387 = vmatprep.subr.bf16.mxu0 %v10187_v11 }
 0x2c5   :  { %6733 = vmatmul.mubr.f32.gmra.mrb[38].mxu0 %v4007_v24 }
 0x2c6   :  { %7173 = vmatpush3.bf16.msra.mxu1 %v10242_v34  ;;  %7389 = vmatpush3.bf16.msra.mxu0 %v9288_v26 }
 0x2c7   :  { %7174 = vmatprep.subr.bf16.mxu1 %v10187_v11  ;;  %7390 = vmatprep.subr.bf16.mxu0 %v10187_v11 }
 0x2c8   :  { %6767 = vmatprep.mubr.msk.f32.mxu0 %vm7918_vm0, %v10186_v33 }
 0x2ca   :  { %7176 = vmatpush3.bf16.msra.mxu1 %v10243_v18  ;;  %7392 = vmatpush3.bf16.msra.mxu0 %v9300_v54 }
 0x2cb   :  { %7177 = vmatprep.subr.bf16.mxu1 %v10187_v11  ;;  %7393 = vmatprep.subr.bf16.mxu0 %v10187_v11 }
 0x2cd   :  { %6277 = vmatmul.mubr.f32.vlgmr.msra.gmra.mrb[20].mxu1 %v2460_v29 }
 0x2ce   :  { %7179 = vmatpush3.bf16.msra.mxu1 %v9238_v37  ;;  %7395 = vmatpush3.bf16.msra.mxu0 %v9312_v49 }
 0x2cf   :  { %6279 = vmatprep.mubr.msk.f32.mxu1 %vm7918_vm0, %v10186_v33  ;;  %7180 = vmatprep.subr.bf16.mxu1 %v10187_v11 }
 0x2d0   :  { %7396 = vmatprep.subr.bf16.mxu0 %v10187_v11 }
 0x2d1   :  { %6280 = vmatmul.mubr.f32.gmra.mrb[22].mxu1 %v2470_v9 }
 0x2d2   :  { %7182 = vmatpush3.bf16.msra.mxu1 %v9250_v2  ;;  %7398 = vmatpush3.bf16.msra.mxu0 %v9322_v6 }
 0x2d3   :  { %6282 = vmatprep.mubr.msk.f32.mxu1 %vm7918_vm0, %v10186_v33  ;;  %7183 = vmatprep.subr.bf16.mxu1 %v10187_v11 }
 0x2d4   :  { %7399 = vmatprep.subr.bf16.mxu0 %v10187_v11 }
 0x2d5   :  { %6283 = vmatmul.mubr.f32.gmra.mrb[24].mxu1 %v2480_v25  ;;  %6768 = vmatmul.mubr.f32.vlgmr.msra.gmra.mrb[30].mxu0 %v9478_v62 }
 0x2d6   :  { %7185 = vmatpush3.bf16.msra.mxu1 %v9262_v0  ;;  %7401 = vmatpush3.bf16.msra.mxu0 %v10236_v40  ;;  %v3989_v0 = vand.u32 4294901760, %v9543_v38 }
 0x2d7   :  { %6285 = vmatprep.mubr.msk.f32.mxu1 %vm7918_vm0, %v10186_v33  ;;  %6770 = vmatprep.mubr.msk.f32.mxu0 %vm7918_vm0, %v10186_v33 }
 0x2d8   :  { %7186 = vmatprep.subr.bf16.mxu1 %v10187_v11  ;;  %7402 = vmatprep.subr.bf16.mxu0 %v10187_v11 }
 0x2d9   :  { %6286 = vmatmul.mubr.f32.gmra.mrb[26].mxu1 %v2490_v3  ;;  %6771 = vmatmul.mubr.f32.gmra.mrb[32].mxu0 %v9489_v13 }
 0x2da   :  { %7188 = vmatpush3.bf16.msra.mxu1 %v9274_v52  ;;  %7404 = vmatpush3.bf16.msra.mxu0 %v10237_v48 }
 0x2db   :  { %6288 = vmatprep.mubr.msk.f32.mxu1 %vm7918_vm0, %v10186_v33  ;;  %6773 = vmatprep.mubr.msk.f32.mxu0 %vm7918_vm0, %v10186_v33 }
 0x2dc   :  { %7189 = vmatprep.subr.bf16.mxu1 %v10187_v11  ;;  %7405 = vmatprep.subr.bf16.mxu0 %v10187_v11 }
 0x2dd   :  { %6289 = vmatmul.mubr.f32.gmra.mrb[28].mxu1 %v2500_v21  ;;  %6774 = vmatmul.mubr.f32.gmra.mrb[34].mxu0 %v9509_v7 }
 0x2de   :  { %7191 = vmatpush3.bf16.msra.mxu1 %v9288_v26  ;;  %7407 = vmatpush3.bf16.msra.mxu0 %v10238_v56 }
 0x2df   :  { %6776 = vmatprep.mubr.msk.f32.mxu0 %vm7918_vm0, %v10186_v33  ;;  %7192 = vmatprep.subr.bf16.mxu1 %v10187_v11 }
 0x2e0   :  { %7408 = vmatprep.subr.bf16.mxu0 %v10187_v11  ;;  %6323 = vmatprep.mubr.msk.f32.mxu1 %vm7918_vm0, %v10186_v33 }
 0x2e1   :  { %6777 = vmatmul.mubr.f32.gmra.mrb[36].mxu0 %v9530_v60 }
 0x2e2   :  { %7194 = vmatpush3.bf16.msra.mxu1 %v9300_v54  ;;  %7410 = vmatpush3.bf16.msra.mxu0 %v10239_v5 }
 0x2e3   :  { %6779 = vmatprep.mubr.msk.f32.mxu0 %vm7918_vm0, %v10186_v33  ;;  %7195 = vmatprep.subr.bf16.mxu1 %v10187_v11 }
 0x2e4   :  { %7411 = vmatprep.subr.bf16.mxu0 %v10187_v11 }
 0x2e5   :  { %6780 = vmatmul.mubr.f32.gmra.mrb[38].mxu0 %v9548_v20 }
 0x2e6   :  { %7197 = vmatpush3.bf16.msra.mxu1 %v9312_v49  ;;  %7413 = vmatpush3.bf16.msra.mxu0 %v10240_v28 }
 0x2e7   :  { %7198 = vmatprep.subr.bf16.mxu1 %v10187_v11  ;;  %7414 = vmatprep.subr.bf16.mxu0 %v10187_v11 }
 0x2e8   :  { %6814 = vmatprep.mubr.msk.f32.mxu0 %vm7918_vm0, %v10186_v33 }
 0x2ea   :  { %7200 = vmatpush3.bf16.msra.mxu1 %v9322_v6  ;;  %7416 = vmatpush3.bf16.msra.mxu0 %v10241_v30 }
 0x2eb   :  { %7201 = vmatprep.subr.bf16.mxu1 %v10187_v11  ;;  %7417 = vmatprep.subr.bf16.mxu0 %v10187_v11 }
 0x2ed   :  { %6324 = vmatmul.mubr.f32.vlgmr.msra.gmra.mrb[20].mxu1 %v9377_v10 }
 0x2ee   :  { %7203 = vmatpush3.bf16.msra.mxu1 %v10236_v40  ;;  %7419 = vmatpush3.bf16.msra.mxu0 %v10242_v34 }
 0x2ef   :  { %6326 = vmatprep.mubr.msk.f32.mxu1 %vm7918_vm0, %v10186_v33  ;;  %7204 = vmatprep.subr.bf16.mxu1 %v10187_v11 }
 0x2f0   :  { %7420 = vmatprep.subr.bf16.mxu0 %v10187_v11 }
 0x2f1   :  { %6327 = vmatmul.mubr.f32.gmra.mrb[22].mxu1 %v9392_v31 }
 0x2f2   :  { %7206 = vmatpush3.bf16.msra.mxu1 %v10237_v48  ;;  %7422 = vmatpush3.bf16.msra.mxu0 %v10243_v18 }
 0x2f3   :  { %6329 = vmatprep.mubr.msk.f32.mxu1 %vm7918_vm0, %v10186_v33  ;;  %7207 = vmatprep.subr.bf16.mxu1 %v10187_v11 }
 0x2f5   :  { %6330 = vmatmul.mubr.f32.gmra.mrb[24].mxu1 %v9402_v15  ;;  %6815 = vmatmul.mubr.f32.vlgmr.msra.gmra.mrb[30].mxu0 %v9478_v62 }
 0x2f6   :  { %7209 = vmatpush3.bf16.msra.mxu1 %v10238_v56  ;;  %6332 = vmatprep.mubr.msk.f32.mxu1 %vm7918_vm0, %v10186_v33 }
 0x2f7   :  { %6817 = vmatprep.mubr.msk.f32.mxu0 %vm7918_vm0, %v10186_v33  ;;  %7210 = vmatprep.subr.bf16.mxu1 %v10187_v11 }
 0x2f9   :  { %6333 = vmatmul.mubr.f32.gmra.mrb[26].mxu1 %v9415_v43  ;;  %6818 = vmatmul.mubr.f32.gmra.mrb[32].mxu0 %v9489_v13 }
 0x2fa   :  { %7212 = vmatpush3.bf16.msra.mxu1 %v10239_v5  ;;  %6335 = vmatprep.mubr.msk.f32.mxu1 %vm7918_vm0, %v10186_v33 }
 0x2fb   :  { %6820 = vmatprep.mubr.msk.f32.mxu0 %vm7918_vm0, %v10186_v33  ;;  %7213 = vmatprep.subr.bf16.mxu1 %v10187_v11 }
 0x2fd   :  { %6336 = vmatmul.mubr.f32.gmra.mrb[28].mxu1 %v9425_v63  ;;  %6821 = vmatmul.mubr.f32.gmra.mrb[34].mxu0 %v9509_v7 }
 0x2fe   :  { %7215 = vmatpush3.bf16.msra.mxu1 %v10240_v28  ;;  %6823 = vmatprep.mubr.msk.f32.mxu0 %vm7918_vm0, %v10186_v33 }
 0x2ff   :  { %7216 = vmatprep.subr.bf16.mxu1 %v10187_v11  ;;  %6370 = vmatprep.mubr.msk.f32.mxu1 %vm7918_vm0, %v10186_v33 }
 0x301   :  { %6824 = vmatmul.mubr.f32.gmra.mrb[36].mxu0 %v9530_v60 }
 0x302   :  { %7218 = vmatpush3.bf16.msra.mxu1 %v10241_v30  ;;  %6826 = vmatprep.mubr.msk.f32.mxu0 %vm7918_vm0, %v10186_v33 }
 0x303   :  { %7219 = vmatprep.subr.bf16.mxu1 %v10187_v11 }
 0x305   :  { %6827 = vmatmul.mubr.f32.gmra.mrb[38].mxu0 %v9548_v20 }
 0x306   :  { %7221 = vmatpush3.bf16.msra.mxu1 %v10242_v34 }
 0x307   :  { %7222 = vmatprep.subr.bf16.mxu1 %v10187_v11 }
 0x30a   :  { %7224 = vmatpush3.bf16.msra.mxu1 %v10243_v18 }
 0x30b   :  { %7279 = vmatprep.subr.bf16.mxu1 %v10187_v11 }
 0x30d   :  { %6371 = vmatmul.mubr.f32.vlgmr.msra.gmra.mrb[20].mxu1 %v9377_v10 }
 0x30e   :  { %7281 = vmatpush3.bf16.msra.mxu1 %v10236_v40  ;;  %6373 = vmatprep.mubr.msk.f32.mxu1 %vm7918_vm0, %v10186_v33 }
 0x30f   :  { %7282 = vmatprep.subr.bf16.mxu1 %v10187_v11 }
 0x311   :  { %6374 = vmatmul.mubr.f32.gmra.mrb[22].mxu1 %v9392_v31 }
 0x312   :  { %7284 = vmatpush3.bf16.msra.mxu1 %v10237_v48  ;;  %6376 = vmatprep.mubr.msk.f32.mxu1 %vm7918_vm0, %v10186_v33 }
 0x313   :  { %7285 = vmatprep.subr.bf16.mxu1 %v10187_v11 }
 0x315   :  { %6377 = vmatmul.mubr.f32.gmra.mrb[24].mxu1 %v9402_v15 }
 0x316   :  { %7287 = vmatpush3.bf16.msra.mxu1 %v10238_v56  ;;  %6379 = vmatprep.mubr.msk.f32.mxu1 %vm7918_vm0, %v10186_v33 }
 0x317   :  { %7288 = vmatprep.subr.bf16.mxu1 %v10187_v11 }
 0x319   :  { %6380 = vmatmul.mubr.f32.gmra.mrb[26].mxu1 %v9415_v43 }
 0x31a   :  { %7290 = vmatpush3.bf16.msra.mxu1 %v10239_v5  ;;  %6382 = vmatprep.mubr.msk.f32.mxu1 %vm7918_vm0, %v10186_v33 }
 0x31b   :  { %7291 = vmatprep.subr.bf16.mxu1 %v10187_v11 }
 0x31d   :  { %6383 = vmatmul.mubr.f32.gmra.mrb[28].mxu1 %v9425_v63 }
 0x31e   :  { %7293 = vmatpush3.bf16.msra.mxu1 %v10240_v28  ;;  %6579 = vmatprep.mubr.msk.f32.mxu1 %vm7918_vm0, %v10186_v33  ;;  %v3969_v28 = vand.u32 4294901760, %v9497_v36 }
 0x31f   :  { %7294 = vmatprep.subr.bf16.mxu1 %v10187_v11 }
 0x320   :  { %v9774_v55 = vpop.f32.mrb[10].mxu1 }
 0x321   :  { %v5928_v32 = vpop.f32.mrb[11].mxu1  ;;  %v1689_v49 = vmul.f32 0.015625, %v9774_v55 }
 0x322   :  { %7296 = vmatpush3.bf16.msra.mxu1 %v10241_v30 }
 0x323   :  { %7297 = vmatprep.subr.bf16.mxu1 %v10187_v11  ;;  %v4702_v10 = vmul.f32 %v1689_v49, %v1689_v49 }
 0x324   :  { %v1667_v40 = vpop.f32.mrb[12].mxu1 }
 0x325   :  { %v5931_v48 = vpop.f32.mrb[13].mxu1  ;;  %v4717_v43 = vsub.f32 %v1689_v49, %v4702_v10 }
 0x326   :  { %7299 = vmatpush3.bf16.msra.mxu1 %v10242_v34  ;;  %v3979_v34 = vand.u32 4294901760, %v9524_v57 }
 0x327   :  { %7300 = vmatprep.subr.bf16.mxu1 %v10187_v11 }
 0x328   :  { %v9780_v56 = vpop.f32.mrb[14].mxu1 }
 0x329   :  { %v5934_v5 = vpop.f32.mrb[15].mxu1  ;;  %v1691_v9 = vmul.f32 0.015625, %v9780_v56 }
 0x32a   :  { %7302 = vmatpush3.bf16.msra.mxu1 %v10243_v18 }
 0x32b   :  { %7303 = vmatprep.subr.bf16.mxu1 %v10187_v11  ;;  %v4704_v53 = vmul.f32 %v1691_v9, %v1691_v9 }
 0x32c   :  { %v9785_v37 = vpop.f32.mrb[16].mxu1 }
 0x32d   :  { %v5937_v30 = vpop.f32.mrb[17].mxu1  ;;  %6580 = vmatmul.mubr.f32.vlgmr.msra.gmra.mrb[30].mxu1 %v3969_v28  ;;  %v9846_v58 = vmul.f32 0.015625, %v9785_v37  ;;  %v4719_v55 = vsub.f32 %v1691_v9, %v4704_v53 }
 0x32e   :  { %7305 = vmatpush3.bf16.msra.mxu1 %v10233_v22  ;;  %6582 = vmatprep.mubr.msk.f32.mxu1 %vm7918_vm0, %v10186_v33  ;;  %v3999_v22 = vand.u32 4294901760, %v9559_v41 }
 0x32f   :  { %7306 = vmatprep.subr.bf16.mxu1 %v10187_v11  ;;  %v4705_v38 = vmul.f32 %v9846_v58, %v9846_v58 }
 0x330   :  { %v9792_v2 = vpop.f32.mrb[18].mxu1 }
 0x331   :  { %v5940_v18 = vpop.f32.mrb[19].mxu1  ;;  %6583 = vmatmul.mubr.f32.gmra.mrb[32].mxu1 %v3979_v34  ;;  %v1693_v27 = vmul.f32 0.015625, %v9792_v2  ;;  %v4720_v37 = vsub.f32 %v9846_v58, %v4705_v38 }
 0x332   :  { %7308 = vmatpush3.bf16.msra.mxu1 %v8731_v44  ;;  %6585 = vmatprep.mubr.msk.f32.mxu1 %vm7918_vm0, %v10186_v33  ;;  %v4009_v44 = vand.u32 4294901760, %v9566_v61 }
 0x333   :  { %7309 = vmatprep.subr.bf16.mxu1 %v10187_v11  ;;  %v4706_v18 = vmul.f32 %v1693_v27, %v1693_v27 }
 0x335   :  { %6586 = vmatmul.mubr.f32.gmra.mrb[34].mxu1 %v3989_v0 }
 0x336   :  { %7311 = vmatpush3.bf16.msra.mxu1 %v10234_v17  ;;  %6588 = vmatprep.mubr.msk.f32.mxu1 %vm7918_vm0, %v10186_v33 }
 0x337   :  { %7312 = vmatprep.subr.bf16.mxu1 %v10187_v11 }
 0x339   :  { %6589 = vmatmul.mubr.f32.gmra.mrb[36].mxu1 %v3999_v22 }
 0x33a   :  { %7314 = vmatpush3.bf16.msra.mxu1 %v8798_v42  ;;  %6591 = vmatprep.mubr.msk.f32.mxu1 %vm7918_vm0, %v10186_v33 }
 0x33b   :  { %7315 = vmatprep.subr.bf16.mxu1 %v10187_v11 }
 0x33d   :  { %6592 = vmatmul.mubr.f32.gmra.mrb[38].mxu1 %v4009_v44 }
 0x33e   :  { %7317 = vmatpush3.bf16.msra.mxu1 %v8806_v14  ;;  %6626 = vmatprep.mubr.msk.f32.mxu1 %vm7918_vm0, %v10186_v33 }
 0x33f   :  { %7318 = vmatprep.subr.bf16.mxu1 %v10187_v11 }
 0x342   :  { %7320 = vmatpush3.bf16.msra.mxu1 %v10235_v59 }
 0x343   :  { %7321 = vmatprep.subr.bf16.mxu1 %v10187_v11 }
 0x346   :  { %7323 = vmatpush3.bf16.msra.mxu1 %v8865_v12 }
 0x347   :  { %7324 = vmatprep.subr.bf16.mxu1 %v10187_v11 }
 0x34a   :  { %7326 = vmatpush3.bf16.msra.mxu1 %v8877_v46 }
 0x34d   :  { %6627 = vmatmul.mubr.f32.vlgmr.msra.gmra.mrb[30].mxu1 %v9478_v62 }
 0x34e   :  { %6629 = vmatprep.mubr.msk.f32.mxu1 %vm7918_vm0, %v10186_v33 }
 0x351   :  { %6630 = vmatmul.mubr.f32.gmra.mrb[32].mxu1 %v9489_v13 }
 0x352   :  { %6632 = vmatprep.mubr.msk.f32.mxu1 %vm7918_vm0, %v10186_v33 }
 0x355   :  { %6633 = vmatmul.mubr.f32.gmra.mrb[34].mxu1 %v9509_v7 }
 0x356   :  { %6635 = vmatprep.mubr.msk.f32.mxu1 %vm7918_vm0, %v10186_v33 }
 0x359   :  { %6636 = vmatmul.mubr.f32.gmra.mrb[36].mxu1 %v9530_v60 }
 0x35a   :  { %6638 = vmatprep.mubr.msk.f32.mxu1 %vm7918_vm0, %v10186_v33  ;;  %v1690_v33 = vmul.f32 0.015625, %v1667_v40 }
 0x35c   :  { %v4703_v15 = vmul.f32 %v1690_v33, %v1690_v33 }
 0x35d   :  { %6639 = vmatmul.mubr.f32.gmra.mrb[38].mxu1 %v9548_v20 }
 0x35e   :  { %v4718_v1 = vsub.f32 %v1690_v33, %v4703_v15 }
 0x3c8   :  { %v9831_v11 = vpop.f32.mrb[30].mxu0 }
 0x3c9   :  { %v6816_v42 = vpop.f32.mrb[31].mxu0 }
 0x3cc   :  { %v9833_v14 = vpop.f32.mrb[32].mxu0 }
 0x3cd   :  { %v6819_v46 = vpop.f32.mrb[33].mxu0 }
 0x3d0   :  { %v9835_v12 = vpop.f32.mrb[34].mxu0 }
 0x3d1   :  { %v6822_v17 = vpop.f32.mrb[35].mxu0 }
 0x3d4   :  { %v9837_v59 = vpop.f32.mrb[36].mxu0 }
 0x3d5   :  { %v6825_v52 = vpop.f32.mrb[37].mxu0 }
 0x3d8   :  { %v9839_v26 = vpop.f32.mrb[38].mxu0 }
 0x3d9   :  { %v6828_v54 = vpop.f32.mrb[39].mxu0 }
 0x3e0   :  { %v3162_v6 = vpop.f32.mrb[20].mxu1 }
 0x3e1   :  { %v3190_v45 = vmul.f32 0.015625, %v3162_v6  ;;  %v6372_v31 = vpop.f32.mrb[21].mxu1 }
 0x3e3   :  { %v4707_v29 = vmul.f32 %v3190_v45, %v3190_v45  ;;  %v9842_v50 = vmul.f32 %v3190_v45, %v1689_v49 }
 0x3e4   :  { %v3168_v8 = vpop.f32.mrb[22].mxu1 }
 0x3e5   :  { %v4722_v25 = vsub.f32 %v3190_v45, %v4707_v29  ;;  %v4737_v51 = vadd.f32 %v4707_v29, %v4702_v10  ;;  %v3191_v63 = vmul.f32 0.015625, %v3168_v8  ;;  %v6375_v3 = vpop.f32.mrb[23].mxu1  ;;  %v9898_v44 = vmul.f32 2.0, %v9842_v50 }
 0x3e6   :  { %v10282_v3 = vmov 0 }
 0x3e7   :  { %v4732_v21 = vadd.f32 %v4722_v25, %v4717_v43  ;;  %vm4742_vm2 = vcmp.gt.f32.partialorder %v4737_v51, 1e-08  ;;  %v4708_v62 = vmul.f32 %v3191_v63, %v3191_v63  ;;  %v9849_v35 = vmul.f32 %v3191_v63, %v1690_v33 }
 0x3e8   :  { %v4747_v13 = vsel %vm4742_vm2, %v4737_v51, 1.0  ;;  %v3174_v36 = vpop.f32.mrb[24].mxu1  ;;  %vm4792_vm5 = vcmp.lt.f32.partialorder %v4737_v51, 1e-08  ;;  %v10280_v43 = vmov 0 }
 0x3e9   :  { %vm4752_vm3 = vcmp.gt.f32.partialorder %v4732_v21, 1e-08  ;;  %vm4762_vm4 = vcmp.lt.f32.partialorder %v4732_v21, 1e-08  ;;  %7727 = vrcp.f32 %v4747_v13  ;;  %v4723_v7 = vsub.f32 %v3191_v63, %v4708_v62  ;;  %v6378_v16 = vpop.f32.mrb[25].mxu1 }
 0x3ea   :  { %v9852_v57 = vsel %vm4752_vm3, %v4732_v21, 1.0  ;;  %v4738_v60 = vadd.f32 %v4708_v62, %v4703_v15  ;;  %v3192_v19 = vmul.f32 0.015625, %v3174_v36  ;;  %vm9855_vm6 = vmand %vm4762_vm4, %vm4742_vm2  ;;  %v4721_v15 = vsub.f32 %v1693_v27, %v4706_v18 }
 0x3eb   :  { %v9863_v20 = vmul.f32 %v9852_v57, %v4747_v13  ;;  %v4733_v47 = vadd.f32 %v4723_v7, %v4718_v1  ;;  %vm9866_vm7 = vmand %vm4752_vm3, %vm4792_vm5  ;;  %v9940_v62 = vmul.f32 2.0, %v9849_v35  ;;  %v10284_v16 = vmov 0 }
 0x3ec   :  { %vm4743_vm8 = vcmp.gt.f32.partialorder %v4738_v60, 1e-08  ;;  %vm4793_vm9 = vcmp.lt.f32.partialorder %v4738_v60, 1e-08  ;;  %v4709_v39 = vmul.f32 %v3192_v19, %v3192_v19  ;;  %v3180_v41 = vpop.f32.mrb[26].mxu1  ;;  %v9870_v24 = vmul.f32 %v3192_v19, %v1691_v9  ;;  %vm9874_vm10 = vmand %vm4752_vm3, %vm4742_vm2 }
 0x3ed   :  { %v4748_v32 = vsel %vm4743_vm8, %v4738_v60, 1.0  ;;  %vm4753_vm11 = vcmp.gt.f32.partialorder %v4733_v47, 1e-08  ;;  %vm4763_vm12 = vcmp.lt.f32.partialorder %v4733_v47, 1e-08  ;;  %v6381_v40 = vpop.f32.mrb[27].mxu1 }
 0x3ee   :  { %v9880_v48 = vsel %vm4753_vm11, %v4733_v47, 1.0  ;;  %7729 = vrcp.f32 %v4748_v32  ;;  %v4724_v56 = vsub.f32 %v3192_v19, %v4709_v39  ;;  %v4739_v5 = vadd.f32 %v4709_v39, %v4704_v53  ;;  %vm9883_vm13 = vmand %vm4763_vm12, %vm4743_vm8 }
 0x3ef   :  { %v9889_v30 = vmul.f32 %v9880_v48, %v4748_v32  ;;  %v3193_v34 = vmul.f32 0.015625, %v3180_v41  ;;  %vm9893_vm14 = vmand %vm4753_vm11, %vm4793_vm9  ;;  %v10289_v47 = vmov 0  ;;  %v9971_v41 = vmul.f32 2.0, %v9870_v24 }
 0x3f0   :  { %v4734_v0 = vadd.f32 %v4724_v56, %v4719_v55  ;;  %vm4744_vm15 = vcmp.gt.f32.partialorder %v4739_v5, 1e-08  ;;  %v3186_v22 = vpop.f32.mrb[28].mxu1  ;;  %vm9902_vm0 = vmand %vm4753_vm11, %vm4743_vm8  ;;  %vm4794_vm1 = vcmp.lt.f32.partialorder %v4739_v5, 1e-08 }
 0x3f1   :  { %v4749_v46 = vsel %vm4744_vm15, %v4739_v5, 1.0  ;;  %v4710_v17 = vmul.f32 %v3193_v34, %v3193_v34  ;;  %v3194_v52 = vmul.f32 0.015625, %v3186_v22  ;;  %v6384_v54 = vpop.f32.mrb[29].mxu1  ;;  %v9908_v49 = vmul.f32 %v3193_v34, %v9846_v58 }
 0x3f2   :  { %vm4754_vm2 = vcmp.gt.f32.partialorder %v4734_v0, 1e-08  ;;  %vm4764_vm3 = vcmp.lt.f32.partialorder %v4734_v0, 1e-08  ;;  %7731 = vrcp.f32 %v4749_v46 }
 0x3f3   :  { %v7728_v33 = vpop.eup %7727  ;;  %v9911_v6 = vsel %vm4754_vm2, %v4734_v0, 1.0  ;;  %v4725_v10 = vsub.f32 %v3193_v34, %v4710_v17  ;;  %v4740_v45 = vadd.f32 %v4710_v17, %v4705_v38  ;;  %v4711_v31 = vmul.f32 %v3194_v52, %v3194_v52  ;;  %vm9914_vm4 = vmand %vm4764_vm3, %vm4744_vm15 }
 0x3f4   :  { %v9919_v9 = vmul.f32 %v9911_v6, %v4749_v46  ;;  %v9922_v8 = vmul.f32 %v7728_v33, %v9898_v44  ;;  %vm9925_vm5 = vmand %vm4754_vm2, %vm4794_vm1  ;;  %v9942_v1 = vmul.f32 %v3194_v52, %v1693_v27  ;;  %v9995_v34 = vmul.f32 2.0, %v9908_v49 }
 0x3f5   :  { %v10281_v43 = vsel %vm9925_vm5, 4294967295, %v10280_v43  ;;  %v4735_v25 = vadd.f32 %v4725_v10, %v4720_v37  ;;  %vm4745_vm8 = vcmp.gt.f32.partialorder %v4740_v45, 1e-08  ;;  %v4726_v51 = vsub.f32 %v3194_v52, %v4711_v31  ;;  %vm9931_vm9 = vmand %vm4754_vm2, %vm4744_vm15 }
 0x3f6   :  { %v4741_v63 = vadd.f32 %v4711_v31, %v4706_v18  ;;  %v10283_v3 = vsel %vm9931_vm9, 4294967295, %v10282_v3  ;;  %v4750_v58 = vsel %vm4745_vm8, %v4740_v45, 1.0  ;;  %v4787_v21 = vsel %vm9855_vm6, %v9922_v8, 1.0 }
 0x3f7   :  { %vm10176_vm11 = vcmp.gt.f32.partialorder %v4735_v25, 1e-08  ;;  %7733 = vrcp.f32 %v4750_v58  ;;  %v4736_v53 = vadd.f32 %v4726_v51, %v4721_v15  ;;  %vm4765_vm15 = vcmp.lt.f32.partialorder %v4735_v25, 1e-08 }
 0x3f8   :  { %vm10175_vm12 = vcmp.gt.f32.partialorder %v4741_v63, 1e-08  ;;  %v7730_v13 = vpop.eup %7729  ;;  %v4760_v36 = vsel %vm10176_vm11, %v4735_v25, 1.0  ;;  %vm9948_vm1 = vmand %vm10176_vm11, %vm4745_vm8  ;;  %vm10288_vm9 = vcmp.gt.f32.partialorder %v4741_v63, 1e-08  ;;  %v10001_v22 = vmul.f32 2.0, %v9942_v1 }
 0x3f9   :  { %v4751_v7 = vsel %vm10175_vm12, %v4741_v63, 1.0  ;;  %v10285_v16 = vsel %vm9948_vm1, 4294967295, %v10284_v16  ;;  %v4835_v60 = vmul.f32 %v4760_v36, %v4750_v58  ;;  %vm10177_vm2 = vcmp.gt.f32.partialorder %v4736_v53, 1e-08  ;;  %vm9956_vm3 = vmand %vm4765_vm15, %vm4745_vm8 }
 0x3fa   :  { %v9953_v19 = vmul.f32 %v7730_v13, %v9940_v62  ;;  %v4761_v27 = vsel %vm10177_vm2, %v4736_v53, 1.0  ;;  %vm4766_vm12 = vcmp.lt.f32.partialorder %v4736_v53, 1e-08  ;;  %7735 = vrcp.f32 %v4751_v7  ;;  %vm9963_vm11 = vmand %vm10177_vm2, %vm10288_vm9 }
 0x3fb   :  { %v10290_v47 = vsel %vm9963_vm11, 4294967295, %v10289_v47  ;;  %vm10291_vm8 = vmmov %vm10288_vm9  ;;  %vm4795_vm1 = vcmp.lt.f32.partialorder %v4740_v45, 1e-08  ;;  %v4836_v32 = vmul.f32 %v4761_v27, %v4751_v7  ;;  %vm4796_vm5 = vcmp.lt.f32.partialorder %v4741_v63, 1e-08 }
 0x3fc   :  { %v4788_v39 = vsel %vm9883_vm13, %v9953_v19, 1.0  ;;  %vm9974_vm15 = vmand %vm4766_vm12, %vm10291_vm8  ;;  %v7732_v40 = vpop.eup %7731  ;;  %vm10294_vm9 = vcmp.gt.f32.partialorder %v4735_v25, 1e-08  ;;  %vm10297_vm13 = vcmp.gt.f32.partialorder %v4736_v53, 1e-08  ;;  %7737 = vrcp.f32 %v9852_v57 }
 0x3fd   :  { %vm9979_vm2 = vmand %vm10294_vm9, %vm4795_vm1  ;;  %v9984_v5 = vmul.f32 %v7732_v40, %v9971_v41  ;;  %7739 = vrcp.f32 %v9863_v20  ;;  %v4852_v53 = vlaneseq }
 0x3fe   :  { %vm9987_vm11 = vmand %vm10297_vm13, %vm4796_vm5  ;;  %7741 = vrcp.f32 %v9880_v48  ;;  %vm10303_vm5 = vnez %v10290_v47 }
 0x3ff   :  { %v4789_v37 = vsel %vm9914_vm4, %v9984_v5, 1.0  ;;  %7743 = vrcp.f32 %v9889_v30 }
 0x400   :  { %7745 = vrcp.f32 %v9911_v6 }
 0x401   :  { %v7734_v18 = vpop.eup %7733  ;;  %7747 = vrcp.f32 %v9919_v9 }
 0x402   :  { %v9998_v0 = vmul.f32 %v7734_v18, %v9995_v34  ;;  %7749 = vrcp.f32 %v4760_v36 }
 0x403   :  { %7751 = vrcp.f32 %v4835_v60 }
 0x404   :  { %v7736_v46 = vpop.eup %7735  ;;  %v4790_v17 = vsel %vm9956_vm3, %v9998_v0, 1.0  ;;  %7753 = vrcp.f32 %v4761_v27 }
 0x405   :  { %v10007_v52 = vmul.f32 %v7736_v46, %v10001_v22  ;;  %v10030_v46 = vand.u32 127, %v4852_v53  ;;  %7755 = vrcp.f32 %v4836_v32 }
 0x406   :  { %v7738_v20 = vpop.eup %7737 }
 0x407   :  { %v4791_v54 = vsel %vm9974_vm15, %v10007_v52, 1.0  ;;  %v7740_v19 = vpop.eup %7739  ;;  %vm4872_vm6 = vcmp.lt.s32.totalorder %v10030_v46, 33  ;;  %vm4897_vm12 = vcmp.eq.s32.totalorder %v10030_v46, 0 }
 0x408   :  { %v7742_v18 = vpop.eup %7741 }
 0x409   :  { %v7744_v8 = vpop.eup %7743 }
 0x420   :  { %v4162_v33 = vpop.f32.mrb[30].mxu1 }
 0x421   :  { %v7428_v10 = vadd.f32 %v9831_v11, %v4162_v33  ;;  %v6628_v45 = vpop.f32.mrb[31].mxu1 }
 0x423   :  { %v4697_v31 = vmul.f32 0.015625, %v7428_v10 }
 0x424   :  { %v4168_v15 = vpop.f32.mrb[32].mxu1 }
 0x425   :  { %v4727_v25 = vsub.f32 %v4697_v31, %v9842_v50  ;;  %v7429_v51 = vadd.f32 %v9833_v14, %v4168_v15  ;;  %v6631_v63 = vpop.f32.mrb[33].mxu1  ;;  %v7746_v31 = vpop.eup %7745 }
 0x427   :  { %v4802_v57 = vmul.f32 2.0, %v4727_v25  ;;  %v4698_v58 = vmul.f32 0.015625, %v7429_v51  ;;  %v7748_v51 = vpop.eup %7747 }
 0x428   :  { %v4174_v11 = vpop.f32.mrb[34].mxu1 }
 0x429   :  { %v4808_v13 = vmul.f32 %v7738_v20, %v4802_v57  ;;  %v4827_v48 = vmul.f32 %v4802_v57, %v9898_v44  ;;  %v4728_v30 = vsub.f32 %v4698_v58, %v9849_v35  ;;  %v7430_v7 = vadd.f32 %v9835_v12, %v4174_v11  ;;  %v6634_v50 = vpop.f32.mrb[35].mxu1 }
 0x42b   :  { %v4817_v14 = vsel %vm9866_vm7, %v4808_v13, %v4787_v21  ;;  %v4838_v6 = vmul.f32 %v7740_v19, %v4827_v48  ;;  %v4803_v9 = vmul.f32 2.0, %v4728_v30  ;;  %v4699_v40 = vmul.f32 0.015625, %v7430_v7 }
 0x42c   :  { %v4180_v44 = vpop.f32.mrb[36].mxu1  ;;  %vm10300_vm7 = vnez %v10281_v43 }
 0x42d   :  { %v4810_v35 = vmul.f32 %v7742_v18, %v4803_v9  ;;  %v4828_v12 = vmul.f32 %v4803_v9, %v9940_v62  ;;  %v4729_v36 = vsub.f32 %v4699_v40, %v9870_v24  ;;  %v7431_v4 = vadd.f32 %v9837_v59, %v4180_v44  ;;  %v6637_v33 = vpop.f32.mrb[37].mxu1 }
 0x42e   :  { %v4847_v23 = vsel %vm9874_vm10, %v4838_v6, %v4817_v14  ;;  %v4853_v62 = vshrl.u32 %v4852_v53, 7  ;;  %vm10301_vm10 = vnez %v10283_v3 }
 0x42f   :  { %v4818_v21 = vsel %vm9893_vm14, %v4810_v35, %v4788_v39  ;;  %v4840_v60 = vmul.f32 %v7744_v8, %v4828_v12  ;;  %v4804_v10 = vmul.f32 2.0, %v4729_v36  ;;  %v4700_v45 = vmul.f32 0.015625, %v7431_v4 }
 0x430   :  { %v4186_v15 = vpop.f32.mrb[38].mxu1  ;;  %v4857_v58 = vadd.s32 32, %v4853_v62 }
 0x431   :  { %v4812_v24 = vmul.f32 %v7746_v31, %v4804_v10  ;;  %v4829_v59 = vmul.f32 %v4804_v10, %v9971_v41  ;;  %v4730_v27 = vsub.f32 %v4700_v45, %v9908_v49  ;;  %v7432_v61 = vadd.f32 %v9839_v26, %v4186_v15  ;;  %v6640_v25 = vpop.f32.mrb[39].mxu1  ;;  %v7750_v41 = vpop.eup %7749 }
 0x432   :  { %v4848_v2 = vsel %vm9902_vm0, %v4840_v60, %v4818_v21  ;;  %v4878_v26 = vsel %vm4872_vm6, %v4847_v23, 0.0  ;;  %v7752_v5 = vpop.eup %7751  ;;  %vm4871_vm14 = vcmp.lt.s32.totalorder %v4857_v58, 33  ;;  %vm10302_vm0 = vnez %v10285_v16 }
 0x433   :  { %v4842_v39 = vmul.f32 %v7748_v51, %v4829_v59  ;;  %v4805_v63 = vmul.f32 2.0, %v4730_v27  ;;  %v4701_v57 = vmul.f32 0.015625, %v7432_v61  ;;  %v4819_v32 = vsel %vm10300_vm7, %v4812_v24, %v4789_v37  ;;  %vm4877_vm4 = vmand %vm4871_vm14, %vm4872_vm6 }
 0x434   :  { %v4879_v49 = vsel %vm4872_vm6, %v4848_v2, 0.0 }
 0x435   :  { %v4814_v42 = vmul.f32 %v7750_v41, %v4805_v63  ;;  %v4830_v20 = vmul.f32 %v4805_v63, %v9995_v34  ;;  %v4731_v11 = vsub.f32 %v4701_v57, %v9942_v1  ;;  %v4849_v29 = vsel %vm10301_vm10, %v4842_v39, %v4819_v32  ;;  %v7754_v34 = vpop.eup %7753 }
 0x436   :  { %v4880_v43 = vsel %vm4872_vm6, %v4849_v29, 0.0  ;;  %v4883_v37 = vadd.f32 %v4879_v49, %v4878_v26  ;;  %v7756_v50 = vpop.eup %7755 }
 0x437   :  { %v4844_v53 = vmul.f32 %v7752_v5, %v4830_v20  ;;  %v4806_v13 = vmul.f32 2.0, %v4731_v11  ;;  %v4820_v48 = vsel %vm9979_vm2, %v4814_v42, %v4790_v17 }
 0x438   :  { %v4884_v1 = vadd.f32 %v4883_v37, %v4880_v43 }
 0x439   :  { %v4816_v30 = vmul.f32 %v7754_v34, %v4806_v13  ;;  %v4831_v3 = vmul.f32 %v4806_v13, %v10001_v22  ;;  %v4850_v7 = vsel %vm10302_vm0, %v4844_v53, %v4820_v48 }
 0x43a   :  { %v4881_v19 = vsel %vm4872_vm6, %v4850_v7, 0.0 }
 0x43b   :  { %v4821_v38 = vsel %vm9987_vm11, %v4816_v30, %v4791_v54  ;;  %v4846_v56 = vmul.f32 %v7756_v50, %v4831_v3  ;;  %v4885_v0 = vadd.f32 %v4884_v1, %v4881_v19  ;;  %vm4896_vm11 = vcmp.eq.s32.totalorder %v4853_v62, 0 }
 0x43c   :  { %vm4898_vm1 = vmand %vm4896_vm11, %vm4897_vm12 }
 0x43d   :  { %v4851_v16 = vsel %vm10303_vm5, %v4846_v56, %v4821_v38 }
 0x43e   :  { %v4882_v22 = vsel %vm4877_vm4, %v4851_v16, 0.0 }
 0x43f   :  { %v4886_v17 = vadd.f32 %v4885_v0, %v4882_v22 }
 0x441   :  { %4887 = vadd.xlane.f32.xlu0 %v4886_v17 }
 0x4ce   :  { %v4888_v14 = vpop.xlane.xlu0 %4887 }
 0x4cf   :  { %v4889_v6 = vrot.slane %v4888_v14, 4 }
 0x4d1   :  { %v4890_v9 = vadd.f32 %v4889_v6, %v4888_v14 }
 0x4d3   :  { %v4891_v55 = vrot.slane %v4890_v9, 2 }
 0x4d5   :  { %v4892_v40 = vadd.f32 %v4891_v55, %v4890_v9 }
 0x4d7   :  { %v4893_v52 = vrot.slane %v4892_v40, 1 }
 0x4d9   :  { %v4894_v18 = vadd.f32 %v4893_v52, %v4892_v40 }
 0x4db   :  { %7713 = vpush %v4894_v18 }
 0x50c   :  { %s7714_s2 = spop %7713 }
 0x50d   :  { %v4899_v47 = vstv %s7714_s2 }
 0x50e   :  { %v4900_v28 = vsel %vm4898_vm1, %v4899_v47, 0.0 }
 0x50f   :  { %4901 = vst [vmem:[#allocation15] sm:$0xff] %v4900_v28 }
 0x510   :  { %7888 = shalt.err (!%p7885_p5)
}
 0x511   :  { %s7889_s29 = scalar_lea.hbm %s10102_s7, 128 }
 0x512   :  { %p7890_p6 = scmp.ne.s32.totalorder %s10102_s7, %s7889_s29  ;;  %p7893_p7 = scmp.lt.u32.totalorder %s7889_s29, %s10102_s7 }
 0x514   :  { %p7895_p8 = pnand %p7893_p7, %p7890_p6 }
 0x516   :  { %7898 = shalt.err (!%p7895_p8)
}
 0x517   :  { %4911 = dma.vmem_to_hbm [thread:$0]  %s4909_s0, 128, %s10102_s7, [#allocation6]  }
 0x518   :  { %7907 = dma.done.wait [#allocation6], 128  }
 0x519   :  { %7908 = vsyncadd [#allocation6], 4294967168 }
 0x51a   :  { %4915 = vsyncpa [#allocation5], 1 }
 0x51b   :  { %4916 = vsyncpa [#allocation10], 1 }
 0x51c   :  { %4917 = vsyncpa [#allocation13], 1 }
 0x51d   :  { %4918 = vsyncpa [#allocation6], 1 }
 0x51e   :  { %4919 = vsyncpa [#allocation7], 1 }

</bundles_post_ra>
